<compile_context>
chip_gen: v7x
topology: tpu7x:2x2x1
jax: 0.10.0
libtpu: 0.0.40
codegen_flags: <defaults>
</compile_context>

<pallas_src>
import functools

import jax
import jax.numpy as jnp
from jax import lax
from jax.experimental import pallas as pl
from jax.experimental.pallas import tpu as pltpu


def _double_conv_kernel(x_ref, top_ref, bot_ref,
                        wd1_ref, wp1_ref, sh1_ref,
                        wd2_ref, wp2_ref, sh2_ref,
                        out_ref, xpad_ref, y1pad_ref,
                        *, tile_h, width, n_tiles_h, compute_dtype):
    """Fused DoubleConv row tile: 2 x (3x3 separable conv + BN + ReLU).

    x_ref   : (1, tile_h, W, Cin)   body row tile (NHWC)
    top_ref : (1, 2, W, Cin)        rows [j*tile_h-2, j*tile_h)   (clamped)
    bot_ref : (1, 2, W, Cin)        rows [(j+1)*tile_h, +2)       (clamped)
    wd*_ref : (3, 3, C)             depthwise weights (f32, VPU path)
    wp*_ref : (Cin, Cout)           pointwise weights, BN scale folded in
    sh*_ref : (1, Cout)             BN shift
    out_ref : (1, tile_h, W, C2)
    xpad_ref : (tile_h+4, W+2, Cin) VMEM staging, 2-row H halo + 1-col W halo
    y1pad_ref: (tile_h+2, W+2, C1)  VMEM intermediate activation (W-padded)
    """
    th, w = tile_h, width
    j = pl.program_id(1)
    cin = x_ref.shape[-1]
    c1 = wp1_ref.shape[-1]
    f32 = jnp.float32

    # ---- stage the input tile (zero only the halos, never the body) --------
    xpad_ref[:, 0:1, :] = jnp.zeros((th + 4, 1, cin), f32)
    xpad_ref[:, w + 1:w + 2, :] = jnp.zeros((th + 4, 1, cin), f32)
    xpad_ref[2:th + 2, 1:w + 1, :] = x_ref[0].astype(f32)

    @pl.when(j > 0)
    def _():
        xpad_ref[0:2, 1:w + 1, :] = top_ref[0].astype(f32)

    @pl.when(j == 0)
    def _():
        xpad_ref[0:2, 1:w + 1, :] = jnp.zeros((2, w, cin), f32)

    @pl.when(j < n_tiles_h - 1)
    def _():
        xpad_ref[th + 2:th + 4, 1:w + 1, :] = bot_ref[0].astype(f32)

    @pl.when(j == n_tiles_h - 1)
    def _():
        xpad_ref[th + 2:th + 4, 1:w + 1, :] = jnp.zeros((2, w, cin), f32)

    # ---- conv1: 3x3 depthwise as 9 VPU shifted MACs (f32) -------------------
    # Computed on tile_h+2 rows so conv2's H-halo never leaves VMEM.
    wd1 = wd1_ref[...]
    acc1 = None
    for dh in range(3):
        for dw in range(3):
            tap = (xpad_ref[dh:dh + th + 2, dw:dw + w, :]
                   * wd1[dh, dw].reshape(1, 1, cin))
            acc1 = tap if acc1 is None else acc1 + tap           # (th+2, W, Cin)

    # ---- conv1 pointwise (one dense MXU matmul) + BN shift + ReLU ----------
    m1 = acc1.reshape((th + 2) * w, cin).astype(compute_dtype)
    y1 = jnp.dot(m1, wp1_ref[...], preferred_element_type=f32)   # ((th+2)W, C1)
    y1 = jnp.maximum(y1 + sh1_ref[...], 0.0)

    y1pad_ref[:, 0:1, :] = jnp.zeros((th + 2, 1, c1), f32)
    y1pad_ref[:, w + 1:w + 2, :] = jnp.zeros((th + 2, 1, c1), f32)
    y1pad_ref[:, 1:w + 1, :] = y1.reshape(th + 2, w, c1)

    # Intermediate rows that fall outside the image are conv2's zero padding.
    # Only the first / last h-tile pays this masking (single row each).
    @pl.when(j == 0)
    def _():
        y1pad_ref[0:1, 1:w + 1, :] = jnp.zeros((1, w, c1), f32)

    @pl.when(j == n_tiles_h - 1)
    def _():
        y1pad_ref[th + 1:th + 2, 1:w + 1, :] = jnp.zeros((1, w, c1), f32)

    # ---- conv2: depthwise (9 VPU MACs) + pointwise MXU + BN shift + ReLU ----
    wd2 = wd2_ref[...]
    acc2 = None
    for dh in range(3):
        for dw in range(3):
            tap = (y1pad_ref[dh:dh + th, dw:dw + w, :]
                   * wd2[dh, dw].reshape(1, 1, c1))
            acc2 = tap if acc2 is None else acc2 + tap           # (th, W, C1)

    m2 = acc2.reshape(th * w, c1).astype(compute_dtype)
    y2 = jnp.dot(m2, wp2_ref[...], preferred_element_type=f32)   # (th*W, C2)
    y2 = jnp.maximum(y2 + sh2_ref[...], 0.0)
    out_ref[0] = y2.reshape(th, w, -1).astype(out_ref.dtype)


def _fold_bn(gamma, beta, mean, var, eps=1e-5):
    scale = gamma / jnp.sqrt(var + eps)
    shift = beta - mean * scale
    return scale, shift


def _prep_weights(params, compute_dtype):
    """Fold BN scale into the pointwise weights; keep depthwise weights f32
    (VPU path) and pointwise weights in the MXU compute dtype."""
    wd1 = params["wd1"].astype(jnp.float32)                        # (3,3,Cin)
    wd2 = params["wd2"].astype(jnp.float32)                        # (3,3,C1)
    wp1 = (params["wp1"] * params["scale1"][None, :]).astype(compute_dtype)
    wp2 = (params["wp2"] * params["scale2"][None, :]).astype(compute_dtype)
    sh1 = params["shift1"].reshape(1, -1).astype(jnp.float32)
    sh2 = params["shift2"].reshape(1, -1).astype(jnp.float32)
    return wd1, wp1, sh1, wd2, wp2, sh2


def _vmem_estimate(tile_h, w, cin, c1, c2, compute_bytes):
    f = 4
    io = 2 * (tile_h * w * cin + 2 * 2 * w * cin) * f          # input blocks x2 buf
    io += 2 * tile_h * w * c2 * f                               # output block x2 buf
    scratch = (tile_h + 4) * (w + 2) * cin * f + (tile_h + 2) * (w + 2) * c1 * f
    temps = (tile_h + 2) * w * (2 * max(cin, c1) + max(c1, c2)) * f
    wts = 9 * (cin + c1) * f + 2 * (cin * c1 + c1 * c2) * compute_bytes \
        + 2 * (c1 + c2) * f
    return io + scratch + temps + wts


def _pick_tile_h(h, w, cin, c1, c2, compute_dtype, budget_bytes):
    """Largest even tile_h dividing H whose estimated VMEM footprint fits."""
    cb = jnp.dtype(compute_dtype).itemsize
    best = None
    th = 2
    while th <= min(h, 256):
        if h % th == 0 and _vmem_estimate(th, w, cin, c1, c2, cb) <= budget_bytes:
            best = th
        th += 2
    if best is None:
        best = next((t for t in range(2, h + 1, 2) if h % t == 0), None)
    return best


def double_conv_nhwc(x_nhwc, params, *, tile_h=None,
                     compute_dtype=jnp.bfloat16, out_dtype=jnp.float32,
                     vmem_limit_bytes=48 * 1024 * 1024):
    """Fused DoubleConv forward (eval mode), NHWC in / NHWC out."""
    n, img_h, width, cin = x_nhwc.shape
    c1 = params["wp1"].shape[1]
    c2 = params["wp2"].shape[1]
    assert params["wp2"].shape[0] == c1

    if tile_h is None:
        # ~60% of the scoped-VMEM budget goes to the per-tile working set.
        tile_h = _pick_tile_h(img_h, width, cin, c1, c2, compute_dtype,
                              int(0.6 * vmem_limit_bytes))
    assert tile_h is not None and img_h % tile_h == 0 and tile_h % 2 == 0, \
        "need an even tile_h that divides H"
    n_tiles_h = img_h // tile_h
    half = tile_h // 2          # halo blocks are 2 rows tall -> H block index
    h_half = img_h // 2

    wd1, wp1, sh1, wd2, wp2, sh2 = _prep_weights(params, compute_dtype)
    x = x_nhwc.astype(jnp.float32)

    kernel = functools.partial(_double_conv_kernel, tile_h=tile_h, width=width,
                               n_tiles_h=n_tiles_h, compute_dtype=compute_dtype)

    out = pl.pallas_call(
        kernel,
        out_shape=jax.ShapeDtypeStruct((n, img_h, width, c2), out_dtype),
        grid_spec=pltpu.PrefetchScalarGridSpec(
            num_scalar_prefetch=0,
            grid=(n, n_tiles_h),
            in_specs=[
                # Body row tile (H-tiled -> pipelined DMA, only tile_h rows
                # resident, not the whole image).
                pl.BlockSpec((1, tile_h, width, cin),
                             lambda i, j: (i, j, 0, 0)),
                # Exactly-2-row halos above / below (clamped at the image
                # border; the kernel zeroes them there under pl.when).
                pl.BlockSpec((1, 2, width, cin),
                             lambda i, j: (i, jnp.maximum(j * half - 1, 0),
                                           0, 0)),
                pl.BlockSpec((1, 2, width, cin),
                             lambda i, j: (i, jnp.minimum((j + 1) * half,
                                                          h_half - 1), 0, 0)),
                # Weights/shifts are tiny (O(Cin*Cout)), so default
                # double-buffering costs only a few KB of VMEM.
                pl.BlockSpec(wd1.shape, lambda i, j: (0, 0, 0)),
                pl.BlockSpec(wp1.shape, lambda i, j: (0, 0)),
                pl.BlockSpec(sh1.shape, lambda i, j: (0, 0)),
                pl.BlockSpec(wd2.shape, lambda i, j: (0, 0, 0)),
                pl.BlockSpec(wp2.shape, lambda i, j: (0, 0)),
                pl.BlockSpec(sh2.shape, lambda i, j: (0, 0)),
            ],
            out_specs=pl.BlockSpec((1, tile_h, width, c2),
                                   lambda i, j: (i, j, 0, 0)),
            scratch_shapes=[
                pltpu.VMEM((tile_h + 4, width + 2, cin), jnp.float32),
                pltpu.VMEM((tile_h + 2, width + 2, c1), jnp.float32),
            ],
        ),
        compiler_params=pltpu.CompilerParams(
            dimension_semantics=("parallel", "parallel"),
            vmem_limit_bytes=vmem_limit_bytes),
    )(x, x, x, wd1, wp1, sh1, wd2, wp2, sh2)

    return out


def double_conv(x_nchw, params, *, tile_h=None, compute_dtype=jnp.bfloat16,
                out_dtype=jnp.float32):
    """PyTorch-layout (NCHW) wrapper around the NHWC core.  In a full network,
    stay in NHWC between DoubleConvs and call double_conv_nhwc directly."""
    x = jnp.transpose(x_nchw, (0, 2, 3, 1))
    y = double_conv_nhwc(x, params, tile_h=tile_h, compute_dtype=compute_dtype,
                         out_dtype=out_dtype)
    return jnp.transpose(y, (0, 3, 1, 2))


def make_params(key, in_channels, out_channels):
    ks = jax.random.split(key, 10)
    wd1 = jax.random.normal(ks[0], (3, 3, in_channels), jnp.float32) * 0.2
    wp1 = jax.random.normal(ks[1], (in_channels, out_channels), jnp.float32) * 0.2
    g1 = 1.0 + 0.1 * jax.random.normal(ks[2], (out_channels,), jnp.float32)
    b1 = 0.1 * jax.random.normal(ks[3], (out_channels,), jnp.float32)
    m1 = 0.1 * jax.random.normal(ks[4], (out_channels,), jnp.float32)
    v1 = 1.0 + 0.1 * jax.random.uniform(ks[5], (out_channels,), jnp.float32)
    scale1, shift1 = _fold_bn(g1, b1, m1, v1)

    wd2 = jax.random.normal(ks[6], (3, 3, out_channels), jnp.float32) * 0.2
    wp2 = jax.random.normal(ks[7], (out_channels, out_channels), jnp.float32) * 0.2
    g2 = 1.0 + 0.1 * jax.random.normal(ks[8], (out_channels,), jnp.float32)
    b2 = 0.1 * jax.random.normal(ks[9], (out_channels,), jnp.float32)
    scale2, shift2 = _fold_bn(g2, b2, jnp.zeros((out_channels,), jnp.float32),
                              jnp.ones((out_channels,), jnp.float32))

    return dict(wd1=wd1, wp1=wp1, scale1=scale1, shift1=shift1,
                wd2=wd2, wp2=wp2, scale2=scale2, shift2=shift2)


# ----------------------- pure-JAX reference (for checking) ------------------
def _ref_block(x_nhwc, wd, wp, scale, shift):
    dn = ("NHWC", "HWIO", "NHWC")
    cin = x_nhwc.shape[-1]
    dwk = wd.reshape(3, 3, 1, cin)
    y = lax.conv_general_dilated(x_nhwc, dwk, (1, 1), "SAME",
                                 dimension_numbers=dn, feature_group_count=cin,
                                 precision=lax.Precision.HIGHEST)
    pwk = wp.reshape(1, 1, *wp.shape)
    y = lax.conv_general_dilated(y, pwk, (1, 1), "SAME", dimension_numbers=dn,
                                 precision=lax.Precision.HIGHEST)
    return jnp.maximum(y * scale + shift, 0.0)


def double_conv_ref(x_nchw, p):
    x = jnp.transpose(x_nchw, (0, 2, 3, 1))
    x = _ref_block(x, p["wd1"], p["wp1"], p["scale1"], p["shift1"])
    x = _ref_block(x, p["wd2"], p["wp2"], p["scale2"], p["shift2"])
    return jnp.transpose(x, (0, 3, 1, 2))


if __name__ == "__main__":
    N, Cin, Cout, H, W = 2, 4, 8, 16, 16
    key = jax.random.PRNGKey(0)
    kx, kp = jax.random.split(key)
    x = jax.random.normal(kx, (N, Cin, H, W), jnp.float32)
    params = make_params(kp, Cin, Cout)

    ref = jax.block_until_ready(double_conv_ref(x, params))

    # f32 MXU operands, tile_h=8 -> grid=(N, 2): exercises the H-halo path.
    fwd_f32 = jax.jit(functools.partial(double_conv, tile_h=8,
                                        compute_dtype=jnp.float32))
    out_f32 = jax.block_until_ready(fwd_f32(x, params))
    assert out_f32.shape == (N, Cout, H, W), out_f32.shape
    err_f32 = float(jnp.max(jnp.abs(out_f32 - ref)))
    assert jnp.allclose(out_f32, ref, atol=1e-2, rtol=1e-2), err_f32

    # Default path: bf16 MXU operands, auto tile_h (single-tile here).
    fwd_bf16 = jax.jit(double_conv)
    out_bf16 = jax.block_until_ready(fwd_bf16(x, params))
    assert out_bf16.shape == (N, Cout, H, W), out_bf16.shape
    err_bf16 = float(jnp.max(jnp.abs(out_bf16 - ref)))
    assert jnp.allclose(out_bf16, ref, atol=5e-2, rtol=5e-2), err_bf16

    print("KERNEL_OK")
</pallas_src>

<mosaic_0001>
module attributes {stable_mosaic.version = 11 : i64} {
  func.func @_double_conv_kernel(%arg0: i32, %arg1: i32, %arg2: memref<1x8x16x4xf32, #tpu.memory_space<vmem>>, %arg3: memref<1x2x16x4xf32, #tpu.memory_space<vmem>>, %arg4: memref<1x2x16x4xf32, #tpu.memory_space<vmem>>, %arg5: memref<3x3x4xf32, #tpu.memory_space<vmem>>, %arg6: memref<4x8xf32, #tpu.memory_space<vmem>>, %arg7: memref<1x8xf32, #tpu.memory_space<vmem>>, %arg8: memref<3x3x8xf32, #tpu.memory_space<vmem>>, %arg9: memref<8x8xf32, #tpu.memory_space<vmem>>, %arg10: memref<1x8xf32, #tpu.memory_space<vmem>>, %arg11: memref<1x8x16x8xf32, #tpu.memory_space<vmem>>, %arg12: memref<12x18x4xf32, #tpu.memory_space<vmem>>, %arg13: memref<10x18x8xf32, #tpu.memory_space<vmem>>) attributes {dimension_semantics = [#tpu.dimension_semantics<parallel>, #tpu.dimension_semantics<parallel>], iteration_bounds = array<i64: 2, 2>, scalar_prefetch = 0 : i64, scratch_operands = 2 : i64, tpu.core_type = #tpu.core_type<tc>, window_params = [{transform_indices = @transform_0, window_bounds = array<i64: 1, 8, 16, 4>}, {transform_indices = @transform_1, window_bounds = array<i64: 1, 2, 16, 4>}, {transform_indices = @transform_2, window_bounds = array<i64: 1, 2, 16, 4>}, {pipeline_mode = #tpu.pipeline_mode<synchronous>, transform_indices = @transform_3, window_bounds = array<i64: 3, 3, 4>}, {pipeline_mode = #tpu.pipeline_mode<synchronous>, transform_indices = @transform_4, window_bounds = array<i64: 4, 8>}, {pipeline_mode = #tpu.pipeline_mode<synchronous>, transform_indices = @transform_5, window_bounds = array<i64: 1, 8>}, {pipeline_mode = #tpu.pipeline_mode<synchronous>, transform_indices = @transform_6, window_bounds = array<i64: 3, 3, 8>}, {pipeline_mode = #tpu.pipeline_mode<synchronous>, transform_indices = @transform_7, window_bounds = array<i64: 8, 8>}, {pipeline_mode = #tpu.pipeline_mode<synchronous>, transform_indices = @transform_8, window_bounds = array<i64: 1, 8>}, {transform_indices = @transform_9, window_bounds = array<i64: 1, 8, 16, 8>}]} {
    %cst = arith.constant 0.000000e+00 : f32
    %0 = vector.broadcast %cst : f32 to vector<12x1x4xf32>
    %c0 = arith.constant 0 : index
    %c0_0 = arith.constant 0 : index
    %c0_1 = arith.constant 0 : index
    %1 = vector.load %arg12[%c0, %c0_0, %c0_1] : memref<12x18x4xf32, #tpu.memory_space<vmem>>, vector<12x1x4xf32>
    tpu.vector_store %arg12[%c0, %c0_0, %c0_1], %0 {strides = array<i32>} : memref<12x18x4xf32, #tpu.memory_space<vmem>>, vector<12x1x4xf32>,
    %cst_2 = arith.constant 0.000000e+00 : f32
    %2 = vector.broadcast %cst_2 : f32 to vector<12x1x4xf32>
    %c0_3 = arith.constant 0 : index
    %c17 = arith.constant 17 : index
    %c0_4 = arith.constant 0 : index
    %3 = vector.load %arg12[%c0_3, %c17, %c0_4] : memref<12x18x4xf32, #tpu.memory_space<vmem>>, vector<12x1x4xf32>
    tpu.vector_store %arg12[%c0_3, %c17, %c0_4], %2 {strides = array<i32>} : memref<12x18x4xf32, #tpu.memory_space<vmem>>, vector<12x1x4xf32>,
    %c0_5 = arith.constant 0 : index
    %c0_6 = arith.constant 0 : index
    %c0_7 = arith.constant 0 : index
    %c0_8 = arith.constant 0 : index
    %4 = vector.load %arg2[%c0_5, %c0_6, %c0_7, %c0_8] : memref<1x8x16x4xf32, #tpu.memory_space<vmem>>, vector<1x8x16x4xf32>
    %5 = vector.shape_cast %4 : vector<1x8x16x4xf32> to vector<8x16x4xf32>
    %c2 = arith.constant 2 : index
    %c1 = arith.constant 1 : index
    %c0_9 = arith.constant 0 : index
    %6 = vector.load %arg12[%c2, %c1, %c0_9] : memref<12x18x4xf32, #tpu.memory_space<vmem>>, vector<8x16x4xf32>
    tpu.vector_store %arg12[%c2, %c1, %c0_9], %5 {strides = array<i32>} : memref<12x18x4xf32, #tpu.memory_space<vmem>>, vector<8x16x4xf32>,
    %c0_i32 = arith.constant 0 : i32
    %7 = arith.cmpi sgt, %arg1, %c0_i32 : i32
    %8 = arith.extui %7 : i1 to i32
    %c0_i32_10 = arith.constant 0 : i32
    %9 = arith.cmpi ne, %8, %c0_i32_10 : i32
    scf.if %9 {
      %c0_107 = arith.constant 0 : index
      %c0_108 = arith.constant 0 : index
      %c0_109 = arith.constant 0 : index
      %c0_110 = arith.constant 0 : index
      %177 = vector.load %arg3[%c0_107, %c0_108, %c0_109, %c0_110] : memref<1x2x16x4xf32, #tpu.memory_space<vmem>>, vector<1x2x16x4xf32>
      %178 = vector.shape_cast %177 : vector<1x2x16x4xf32> to vector<2x16x4xf32>
      %c0_111 = arith.constant 0 : index
      %c1_112 = arith.constant 1 : index
      %c0_113 = arith.constant 0 : index
      %179 = vector.load %arg12[%c0_111, %c1_112, %c0_113] : memref<12x18x4xf32, #tpu.memory_space<vmem>>, vector<2x16x4xf32>
      tpu.vector_store %arg12[%c0_111, %c1_112, %c0_113], %178 {strides = array<i32>} : memref<12x18x4xf32, #tpu.memory_space<vmem>>, vector<2x16x4xf32>,
    } else {
    }
    %c0_i32_11 = arith.constant 0 : i32
    %10 = arith.cmpi eq, %arg1, %c0_i32_11 : i32
    %11 = arith.extui %10 : i1 to i32
    %c0_i32_12 = arith.constant 0 : i32
    %12 = arith.cmpi ne, %11, %c0_i32_12 : i32
    scf.if %12 {
      %cst_107 = arith.constant 0.000000e+00 : f32
      %177 = vector.broadcast %cst_107 : f32 to vector<2x16x4xf32>
      %c0_108 = arith.constant 0 : index
      %c1_109 = arith.constant 1 : index
      %c0_110 = arith.constant 0 : index
      %178 = vector.load %arg12[%c0_108, %c1_109, %c0_110] : memref<12x18x4xf32, #tpu.memory_space<vmem>>, vector<2x16x4xf32>
      tpu.vector_store %arg12[%c0_108, %c1_109, %c0_110], %177 {strides = array<i32>} : memref<12x18x4xf32, #tpu.memory_space<vmem>>, vector<2x16x4xf32>,
    } else {
    }
    %c1_i32 = arith.constant 1 : i32
    %13 = arith.cmpi slt, %arg1, %c1_i32 : i32
    %14 = arith.extui %13 : i1 to i32
    %c0_i32_13 = arith.constant 0 : i32
    %15 = arith.cmpi ne, %14, %c0_i32_13 : i32
    scf.if %15 {
      %c0_107 = arith.constant 0 : index
      %c0_108 = arith.constant 0 : index
      %c0_109 = arith.constant 0 : index
      %c0_110 = arith.constant 0 : index
      %177 = vector.load %arg4[%c0_107, %c0_108, %c0_109, %c0_110] : memref<1x2x16x4xf32, #tpu.memory_space<vmem>>, vector<1x2x16x4xf32>
      %178 = vector.shape_cast %177 : vector<1x2x16x4xf32> to vector<2x16x4xf32>
      %c10 = arith.constant 10 : index
      %c1_111 = arith.constant 1 : index
      %c0_112 = arith.constant 0 : index
      %179 = vector.load %arg12[%c10, %c1_111, %c0_112] : memref<12x18x4xf32, #tpu.memory_space<vmem>>, vector<2x16x4xf32>
      tpu.vector_store %arg12[%c10, %c1_111, %c0_112], %178 {strides = array<i32>} : memref<12x18x4xf32, #tpu.memory_space<vmem>>, vector<2x16x4xf32>,
    } else {
    }
    %c1_i32_14 = arith.constant 1 : i32
    %16 = arith.cmpi eq, %arg1, %c1_i32_14 : i32
    %17 = arith.extui %16 : i1 to i32
    %c0_i32_15 = arith.constant 0 : i32
    %18 = arith.cmpi ne, %17, %c0_i32_15 : i32
    scf.if %18 {
      %cst_107 = arith.constant 0.000000e+00 : f32
      %177 = vector.broadcast %cst_107 : f32 to vector<2x16x4xf32>
      %c10 = arith.constant 10 : index
      %c1_108 = arith.constant 1 : index
      %c0_109 = arith.constant 0 : index
      %178 = vector.load %arg12[%c10, %c1_108, %c0_109] : memref<12x18x4xf32, #tpu.memory_space<vmem>>, vector<2x16x4xf32>
      tpu.vector_store %arg12[%c10, %c1_108, %c0_109], %177 {strides = array<i32>} : memref<12x18x4xf32, #tpu.memory_space<vmem>>, vector<2x16x4xf32>,
    } else {
    }
    %c0_16 = arith.constant 0 : index
    %c0_17 = arith.constant 0 : index
    %c0_18 = arith.constant 0 : index
    %19 = vector.load %arg5[%c0_16, %c0_17, %c0_18] : memref<3x3x4xf32, #tpu.memory_space<vmem>>, vector<3x3x4xf32>
    %c0_19 = arith.constant 0 : index
    %c0_20 = arith.constant 0 : index
    %c0_21 = arith.constant 0 : index
    %20 = vector.load %arg12[%c0_19, %c0_20, %c0_21] : memref<12x18x4xf32, #tpu.memory_space<vmem>>, vector<10x16x4xf32>
    %21 = vector.extract_strided_slice %19 {offsets = [0, 0, 0], sizes = [1, 1, 4], strides = [1, 1, 1]} : vector<3x3x4xf32> to vector<1x1x4xf32>
    %22 = vector.shape_cast %21 : vector<1x1x4xf32> to vector<4xf32>
    %23 = vector.shape_cast %22 : vector<4xf32> to vector<1x1x4xf32>
    %24 = vector.broadcast %23 : vector<1x1x4xf32> to vector<10x16x4xf32>
    %25 = arith.mulf %20, %24 : vector<10x16x4xf32>
    %c0_22 = arith.constant 0 : index
    %c1_23 = arith.constant 1 : index
    %c0_24 = arith.constant 0 : index
    %26 = vector.load %arg12[%c0_22, %c1_23, %c0_24] : memref<12x18x4xf32, #tpu.memory_space<vmem>>, vector<10x16x4xf32>
    %27 = vector.extract_strided_slice %19 {offsets = [0, 1, 0], sizes = [1, 1, 4], strides = [1, 1, 1]} : vector<3x3x4xf32> to vector<1x1x4xf32>
    %28 = vector.shape_cast %27 : vector<1x1x4xf32> to vector<4xf32>
    %29 = vector.shape_cast %28 : vector<4xf32> to vector<1x1x4xf32>
    %30 = vector.broadcast %29 : vector<1x1x4xf32> to vector<10x16x4xf32>
    %31 = arith.mulf %26, %30 : vector<10x16x4xf32>
    %32 = arith.addf %25, %31 : vector<10x16x4xf32>
    %c0_25 = arith.constant 0 : index
    %c2_26 = arith.constant 2 : index
    %c0_27 = arith.constant 0 : index
    %33 = vector.load %arg12[%c0_25, %c2_26, %c0_27] : memref<12x18x4xf32, #tpu.memory_space<vmem>>, vector<10x16x4xf32>
    %34 = vector.extract_strided_slice %19 {offsets = [0, 2, 0], sizes = [1, 1, 4], strides = [1, 1, 1]} : vector<3x3x4xf32> to vector<1x1x4xf32>
    %35 = vector.shape_cast %34 : vector<1x1x4xf32> to vector<4xf32>
    %36 = vector.shape_cast %35 : vector<4xf32> to vector<1x1x4xf32>
    %37 = vector.broadcast %36 : vector<1x1x4xf32> to vector<10x16x4xf32>
    %38 = arith.mulf %33, %37 : vector<10x16x4xf32>
    %39 = arith.addf %32, %38 : vector<10x16x4xf32>
    %c1_28 = arith.constant 1 : index
    %c0_29 = arith.constant 0 : index
    %c0_30 = arith.constant 0 : index
    %40 = vector.load %arg12[%c1_28, %c0_29, %c0_30] : memref<12x18x4xf32, #tpu.memory_space<vmem>>, vector<10x16x4xf32>
    %41 = vector.extract_strided_slice %19 {offsets = [1, 0, 0], sizes = [1, 1, 4], strides = [1, 1, 1]} : vector<3x3x4xf32> to vector<1x1x4xf32>
    %42 = vector.shape_cast %41 : vector<1x1x4xf32> to vector<4xf32>
    %43 = vector.shape_cast %42 : vector<4xf32> to vector<1x1x4xf32>
    %44 = vector.broadcast %43 : vector<1x1x4xf32> to vector<10x16x4xf32>
    %45 = arith.mulf %40, %44 : vector<10x16x4xf32>
    %46 = arith.addf %39, %45 : vector<10x16x4xf32>
    %c1_31 = arith.constant 1 : index
    %c1_32 = arith.constant 1 : index
    %c0_33 = arith.constant 0 : index
    %47 = vector.load %arg12[%c1_31, %c1_32, %c0_33] : memref<12x18x4xf32, #tpu.memory_space<vmem>>, vector<10x16x4xf32>
    %48 = vector.extract_strided_slice %19 {offsets = [1, 1, 0], sizes = [1, 1, 4], strides = [1, 1, 1]} : vector<3x3x4xf32> to vector<1x1x4xf32>
    %49 = vector.shape_cast %48 : vector<1x1x4xf32> to vector<4xf32>
    %50 = vector.shape_cast %49 : vector<4xf32> to vector<1x1x4xf32>
    %51 = vector.broadcast %50 : vector<1x1x4xf32> to vector<10x16x4xf32>
    %52 = arith.mulf %47, %51 : vector<10x16x4xf32>
    %53 = arith.addf %46, %52 : vector<10x16x4xf32>
    %c1_34 = arith.constant 1 : index
    %c2_35 = arith.constant 2 : index
    %c0_36 = arith.constant 0 : index
    %54 = vector.load %arg12[%c1_34, %c2_35, %c0_36] : memref<12x18x4xf32, #tpu.memory_space<vmem>>, vector<10x16x4xf32>
    %55 = vector.extract_strided_slice %19 {offsets = [1, 2, 0], sizes = [1, 1, 4], strides = [1, 1, 1]} : vector<3x3x4xf32> to vector<1x1x4xf32>
    %56 = vector.shape_cast %55 : vector<1x1x4xf32> to vector<4xf32>
    %57 = vector.shape_cast %56 : vector<4xf32> to vector<1x1x4xf32>
    %58 = vector.broadcast %57 : vector<1x1x4xf32> to vector<10x16x4xf32>
    %59 = arith.mulf %54, %58 : vector<10x16x4xf32>
    %60 = arith.addf %53, %59 : vector<10x16x4xf32>
    %c2_37 = arith.constant 2 : index
    %c0_38 = arith.constant 0 : index
    %c0_39 = arith.constant 0 : index
    %61 = vector.load %arg12[%c2_37, %c0_38, %c0_39] : memref<12x18x4xf32, #tpu.memory_space<vmem>>, vector<10x16x4xf32>
    %62 = vector.extract_strided_slice %19 {offsets = [2, 0, 0], sizes = [1, 1, 4], strides = [1, 1, 1]} : vector<3x3x4xf32> to vector<1x1x4xf32>
    %63 = vector.shape_cast %62 : vector<1x1x4xf32> to vector<4xf32>
    %64 = vector.shape_cast %63 : vector<4xf32> to vector<1x1x4xf32>
    %65 = vector.broadcast %64 : vector<1x1x4xf32> to vector<10x16x4xf32>
    %66 = arith.mulf %61, %65 : vector<10x16x4xf32>
    %67 = arith.addf %60, %66 : vector<10x16x4xf32>
    %c2_40 = arith.constant 2 : index
    %c1_41 = arith.constant 1 : index
    %c0_42 = arith.constant 0 : index
    %68 = vector.load %arg12[%c2_40, %c1_41, %c0_42] : memref<12x18x4xf32, #tpu.memory_space<vmem>>, vector<10x16x4xf32>
    %69 = vector.extract_strided_slice %19 {offsets = [2, 1, 0], sizes = [1, 1, 4], strides = [1, 1, 1]} : vector<3x3x4xf32> to vector<1x1x4xf32>
    %70 = vector.shape_cast %69 : vector<1x1x4xf32> to vector<4xf32>
    %71 = vector.shape_cast %70 : vector<4xf32> to vector<1x1x4xf32>
    %72 = vector.broadcast %71 : vector<1x1x4xf32> to vector<10x16x4xf32>
    %73 = arith.mulf %68, %72 : vector<10x16x4xf32>
    %74 = arith.addf %67, %73 : vector<10x16x4xf32>
    %c2_43 = arith.constant 2 : index
    %c2_44 = arith.constant 2 : index
    %c0_45 = arith.constant 0 : index
    %75 = vector.load %arg12[%c2_43, %c2_44, %c0_45] : memref<12x18x4xf32, #tpu.memory_space<vmem>>, vector<10x16x4xf32>
    %76 = vector.extract_strided_slice %19 {offsets = [2, 2, 0], sizes = [1, 1, 4], strides = [1, 1, 1]} : vector<3x3x4xf32> to vector<1x1x4xf32>
    %77 = vector.shape_cast %76 : vector<1x1x4xf32> to vector<4xf32>
    %78 = vector.shape_cast %77 : vector<4xf32> to vector<1x1x4xf32>
    %79 = vector.broadcast %78 : vector<1x1x4xf32> to vector<10x16x4xf32>
    %80 = arith.mulf %75, %79 : vector<10x16x4xf32>
    %81 = arith.addf %74, %80 : vector<10x16x4xf32>
    %82 = vector.shape_cast %81 : vector<10x16x4xf32> to vector<160x4xf32>
    %c0_46 = arith.constant 0 : index
    %c0_47 = arith.constant 0 : index
    %83 = vector.load %arg6[%c0_46, %c0_47] : memref<4x8xf32, #tpu.memory_space<vmem>>, vector<4x8xf32>
    %cst_48 = arith.constant dense<0.000000e+00> : vector<160x8xf32>
    %84 = tpu.matmul %82, %83, %cst_48 {dimension_numbers = #tpu.dot_dimension_numbers<[1], [0], [0], [1], [0, 0, 1, 1], [], []>} : vector<160x4xf32>, vector<4x8xf32>, vector<160x8xf32> -> vector<160x8xf32>
    %c0_49 = arith.constant 0 : index
    %c0_50 = arith.constant 0 : index
    %85 = vector.load %arg7[%c0_49, %c0_50] : memref<1x8xf32, #tpu.memory_space<vmem>>, vector<1x8xf32>
    %86 = vector.broadcast %85 : vector<1x8xf32> to vector<160x8xf32>
    %87 = arith.addf %84, %86 : vector<160x8xf32>
    %cst_51 = arith.constant 0.000000e+00 : f32
    %88 = vector.broadcast %cst_51 : f32 to vector<160x8xf32>
    %89 = arith.maximumf %87, %88 : vector<160x8xf32>
    %cst_52 = arith.constant 0.000000e+00 : f32
    %90 = vector.broadcast %cst_52 : f32 to vector<10x1x8xf32>
    %c0_53 = arith.constant 0 : index
    %c0_54 = arith.constant 0 : index
    %c0_55 = arith.constant 0 : index
    %91 = vector.load %arg13[%c0_53, %c0_54, %c0_55] : memref<10x18x8xf32, #tpu.memory_space<vmem>>, vector<10x1x8xf32>
    tpu.vector_store %arg13[%c0_53, %c0_54, %c0_55], %90 {strides = array<i32>} : memref<10x18x8xf32, #tpu.memory_space<vmem>>, vector<10x1x8xf32>,
    %cst_56 = arith.constant 0.000000e+00 : f32
    %92 = vector.broadcast %cst_56 : f32 to vector<10x1x8xf32>
    %c0_57 = arith.constant 0 : index
    %c17_58 = arith.constant 17 : index
    %c0_59 = arith.constant 0 : index
    %93 = vector.load %arg13[%c0_57, %c17_58, %c0_59] : memref<10x18x8xf32, #tpu.memory_space<vmem>>, vector<10x1x8xf32>
    tpu.vector_store %arg13[%c0_57, %c17_58, %c0_59], %92 {strides = array<i32>} : memref<10x18x8xf32, #tpu.memory_space<vmem>>, vector<10x1x8xf32>,
    %94 = vector.shape_cast %89 : vector<160x8xf32> to vector<10x16x8xf32>
    %c0_60 = arith.constant 0 : index
    %c1_61 = arith.constant 1 : index
    %c0_62 = arith.constant 0 : index
    %95 = vector.load %arg13[%c0_60, %c1_61, %c0_62] : memref<10x18x8xf32, #tpu.memory_space<vmem>>, vector<10x16x8xf32>
    tpu.vector_store %arg13[%c0_60, %c1_61, %c0_62], %94 {strides = array<i32>} : memref<10x18x8xf32, #tpu.memory_space<vmem>>, vector<10x16x8xf32>,
    %c0_i32_63 = arith.constant 0 : i32
    %96 = arith.cmpi eq, %arg1, %c0_i32_63 : i32
    %97 = arith.extui %96 : i1 to i32
    %c0_i32_64 = arith.constant 0 : i32
    %98 = arith.cmpi ne, %97, %c0_i32_64 : i32
    scf.if %98 {
      %cst_107 = arith.constant 0.000000e+00 : f32
      %177 = vector.broadcast %cst_107 : f32 to vector<1x16x8xf32>
      %c0_108 = arith.constant 0 : index
      %c1_109 = arith.constant 1 : index
      %c0_110 = arith.constant 0 : index
      %178 = vector.load %arg13[%c0_108, %c1_109, %c0_110] : memref<10x18x8xf32, #tpu.memory_space<vmem>>, vector<1x16x8xf32>
      tpu.vector_store %arg13[%c0_108, %c1_109, %c0_110], %177 {strides = array<i32>} : memref<10x18x8xf32, #tpu.memory_space<vmem>>, vector<1x16x8xf32>,
    } else {
    }
    %c1_i32_65 = arith.constant 1 : i32
    %99 = arith.cmpi eq, %arg1, %c1_i32_65 : i32
    %100 = arith.extui %99 : i1 to i32
    %c0_i32_66 = arith.constant 0 : i32
    %101 = arith.cmpi ne, %100, %c0_i32_66 : i32
    scf.if %101 {
      %cst_107 = arith.constant 0.000000e+00 : f32
      %177 = vector.broadcast %cst_107 : f32 to vector<1x16x8xf32>
      %c9 = arith.constant 9 : index
      %c1_108 = arith.constant 1 : index
      %c0_109 = arith.constant 0 : index
      %178 = vector.load %arg13[%c9, %c1_108, %c0_109] : memref<10x18x8xf32, #tpu.memory_space<vmem>>, vector<1x16x8xf32>
      tpu.vector_store %arg13[%c9, %c1_108, %c0_109], %177 {strides = array<i32>} : memref<10x18x8xf32, #tpu.memory_space<vmem>>, vector<1x16x8xf32>,
    } else {
    }
    %c0_67 = arith.constant 0 : index
    %c0_68 = arith.constant 0 : index
    %c0_69 = arith.constant 0 : index
    %102 = vector.load %arg8[%c0_67, %c0_68, %c0_69] : memref<3x3x8xf32, #tpu.memory_space<vmem>>, vector<3x3x8xf32>
    %c0_70 = arith.constant 0 : index
    %c0_71 = arith.constant 0 : index
    %c0_72 = arith.constant 0 : index
    %103 = vector.load %arg13[%c0_70, %c0_71, %c0_72] : memref<10x18x8xf32, #tpu.memory_space<vmem>>, vector<8x16x8xf32>
    %104 = vector.extract_strided_slice %102 {offsets = [0, 0, 0], sizes = [1, 1, 8], strides = [1, 1, 1]} : vector<3x3x8xf32> to vector<1x1x8xf32>
    %105 = vector.shape_cast %104 : vector<1x1x8xf32> to vector<8xf32>
    %106 = vector.shape_cast %105 : vector<8xf32> to vector<1x1x8xf32>
    %107 = vector.broadcast %106 : vector<1x1x8xf32> to vector<8x16x8xf32>
    %108 = arith.mulf %103, %107 : vector<8x16x8xf32>
    %c0_73 = arith.constant 0 : index
    %c1_74 = arith.constant 1 : index
    %c0_75 = arith.constant 0 : index
    %109 = vector.load %arg13[%c0_73, %c1_74, %c0_75] : memref<10x18x8xf32, #tpu.memory_space<vmem>>, vector<8x16x8xf32>
    %110 = vector.extract_strided_slice %102 {offsets = [0, 1, 0], sizes = [1, 1, 8], strides = [1, 1, 1]} : vector<3x3x8xf32> to vector<1x1x8xf32>
    %111 = vector.shape_cast %110 : vector<1x1x8xf32> to vector<8xf32>
    %112 = vector.shape_cast %111 : vector<8xf32> to vector<1x1x8xf32>
    %113 = vector.broadcast %112 : vector<1x1x8xf32> to vector<8x16x8xf32>
    %114 = arith.mulf %109, %113 : vector<8x16x8xf32>
    %115 = arith.addf %108, %114 : vector<8x16x8xf32>
    %c0_76 = arith.constant 0 : index
    %c2_77 = arith.constant 2 : index
    %c0_78 = arith.constant 0 : index
    %116 = vector.load %arg13[%c0_76, %c2_77, %c0_78] : memref<10x18x8xf32, #tpu.memory_space<vmem>>, vector<8x16x8xf32>
    %117 = vector.extract_strided_slice %102 {offsets = [0, 2, 0], sizes = [1, 1, 8], strides = [1, 1, 1]} : vector<3x3x8xf32> to vector<1x1x8xf32>
    %118 = vector.shape_cast %117 : vector<1x1x8xf32> to vector<8xf32>
    %119 = vector.shape_cast %118 : vector<8xf32> to vector<1x1x8xf32>
    %120 = vector.broadcast %119 : vector<1x1x8xf32> to vector<8x16x8xf32>
    %121 = arith.mulf %116, %120 : vector<8x16x8xf32>
    %122 = arith.addf %115, %121 : vector<8x16x8xf32>
    %c1_79 = arith.constant 1 : index
    %c0_80 = arith.constant 0 : index
    %c0_81 = arith.constant 0 : index
    %123 = vector.load %arg13[%c1_79, %c0_80, %c0_81] : memref<10x18x8xf32, #tpu.memory_space<vmem>>, vector<8x16x8xf32>
    %124 = vector.extract_strided_slice %102 {offsets = [1, 0, 0], sizes = [1, 1, 8], strides = [1, 1, 1]} : vector<3x3x8xf32> to vector<1x1x8xf32>
    %125 = vector.shape_cast %124 : vector<1x1x8xf32> to vector<8xf32>
    %126 = vector.shape_cast %125 : vector<8xf32> to vector<1x1x8xf32>
    %127 = vector.broadcast %126 : vector<1x1x8xf32> to vector<8x16x8xf32>
    %128 = arith.mulf %123, %127 : vector<8x16x8xf32>
    %129 = arith.addf %122, %128 : vector<8x16x8xf32>
    %c1_82 = arith.constant 1 : index
    %c1_83 = arith.constant 1 : index
    %c0_84 = arith.constant 0 : index
    %130 = vector.load %arg13[%c1_82, %c1_83, %c0_84] : memref<10x18x8xf32, #tpu.memory_space<vmem>>, vector<8x16x8xf32>
    %131 = vector.extract_strided_slice %102 {offsets = [1, 1, 0], sizes = [1, 1, 8], strides = [1, 1, 1]} : vector<3x3x8xf32> to vector<1x1x8xf32>
    %132 = vector.shape_cast %131 : vector<1x1x8xf32> to vector<8xf32>
    %133 = vector.shape_cast %132 : vector<8xf32> to vector<1x1x8xf32>
    %134 = vector.broadcast %133 : vector<1x1x8xf32> to vector<8x16x8xf32>
    %135 = arith.mulf %130, %134 : vector<8x16x8xf32>
    %136 = arith.addf %129, %135 : vector<8x16x8xf32>
    %c1_85 = arith.constant 1 : index
    %c2_86 = arith.constant 2 : index
    %c0_87 = arith.constant 0 : index
    %137 = vector.load %arg13[%c1_85, %c2_86, %c0_87] : memref<10x18x8xf32, #tpu.memory_space<vmem>>, vector<8x16x8xf32>
    %138 = vector.extract_strided_slice %102 {offsets = [1, 2, 0], sizes = [1, 1, 8], strides = [1, 1, 1]} : vector<3x3x8xf32> to vector<1x1x8xf32>
    %139 = vector.shape_cast %138 : vector<1x1x8xf32> to vector<8xf32>
    %140 = vector.shape_cast %139 : vector<8xf32> to vector<1x1x8xf32>
    %141 = vector.broadcast %140 : vector<1x1x8xf32> to vector<8x16x8xf32>
    %142 = arith.mulf %137, %141 : vector<8x16x8xf32>
    %143 = arith.addf %136, %142 : vector<8x16x8xf32>
    %c2_88 = arith.constant 2 : index
    %c0_89 = arith.constant 0 : index
    %c0_90 = arith.constant 0 : index
    %144 = vector.load %arg13[%c2_88, %c0_89, %c0_90] : memref<10x18x8xf32, #tpu.memory_space<vmem>>, vector<8x16x8xf32>
    %145 = vector.extract_strided_slice %102 {offsets = [2, 0, 0], sizes = [1, 1, 8], strides = [1, 1, 1]} : vector<3x3x8xf32> to vector<1x1x8xf32>
    %146 = vector.shape_cast %145 : vector<1x1x8xf32> to vector<8xf32>
    %147 = vector.shape_cast %146 : vector<8xf32> to vector<1x1x8xf32>
    %148 = vector.broadcast %147 : vector<1x1x8xf32> to vector<8x16x8xf32>
    %149 = arith.mulf %144, %148 : vector<8x16x8xf32>
    %150 = arith.addf %143, %149 : vector<8x16x8xf32>
    %c2_91 = arith.constant 2 : index
    %c1_92 = arith.constant 1 : index
    %c0_93 = arith.constant 0 : index
    %151 = vector.load %arg13[%c2_91, %c1_92, %c0_93] : memref<10x18x8xf32, #tpu.memory_space<vmem>>, vector<8x16x8xf32>
    %152 = vector.extract_strided_slice %102 {offsets = [2, 1, 0], sizes = [1, 1, 8], strides = [1, 1, 1]} : vector<3x3x8xf32> to vector<1x1x8xf32>
    %153 = vector.shape_cast %152 : vector<1x1x8xf32> to vector<8xf32>
    %154 = vector.shape_cast %153 : vector<8xf32> to vector<1x1x8xf32>
    %155 = vector.broadcast %154 : vector<1x1x8xf32> to vector<8x16x8xf32>
    %156 = arith.mulf %151, %155 : vector<8x16x8xf32>
    %157 = arith.addf %150, %156 : vector<8x16x8xf32>
    %c2_94 = arith.constant 2 : index
    %c2_95 = arith.constant 2 : index
    %c0_96 = arith.constant 0 : index
    %158 = vector.load %arg13[%c2_94, %c2_95, %c0_96] : memref<10x18x8xf32, #tpu.memory_space<vmem>>, vector<8x16x8xf32>
    %159 = vector.extract_strided_slice %102 {offsets = [2, 2, 0], sizes = [1, 1, 8], strides = [1, 1, 1]} : vector<3x3x8xf32> to vector<1x1x8xf32>
    %160 = vector.shape_cast %159 : vector<1x1x8xf32> to vector<8xf32>
    %161 = vector.shape_cast %160 : vector<8xf32> to vector<1x1x8xf32>
    %162 = vector.broadcast %161 : vector<1x1x8xf32> to vector<8x16x8xf32>
    %163 = arith.mulf %158, %162 : vector<8x16x8xf32>
    %164 = arith.addf %157, %163 : vector<8x16x8xf32>
    %165 = vector.shape_cast %164 : vector<8x16x8xf32> to vector<128x8xf32>
    %c0_97 = arith.constant 0 : index
    %c0_98 = arith.constant 0 : index
    %166 = vector.load %arg9[%c0_97, %c0_98] : memref<8x8xf32, #tpu.memory_space<vmem>>, vector<8x8xf32>
    %cst_99 = arith.constant dense<0.000000e+00> : vector<128x8xf32>
    %167 = tpu.matmul %165, %166, %cst_99 {dimension_numbers = #tpu.dot_dimension_numbers<[1], [0], [0], [1], [0, 0, 1, 1], [], []>} : vector<128x8xf32>, vector<8x8xf32>, vector<128x8xf32> -> vector<128x8xf32>
    %c0_100 = arith.constant 0 : index
    %c0_101 = arith.constant 0 : index
    %168 = vector.load %arg10[%c0_100, %c0_101] : memref<1x8xf32, #tpu.memory_space<vmem>>, vector<1x8xf32>
    %169 = vector.broadcast %168 : vector<1x8xf32> to vector<128x8xf32>
    %170 = arith.addf %167, %169 : vector<128x8xf32>
    %cst_102 = arith.constant 0.000000e+00 : f32
    %171 = vector.broadcast %cst_102 : f32 to vector<128x8xf32>
    %172 = arith.maximumf %170, %171 : vector<128x8xf32>
    %173 = vector.shape_cast %172 : vector<128x8xf32> to vector<8x16x8xf32>
    %c0_103 = arith.constant 0 : index
    %c0_104 = arith.constant 0 : index
    %c0_105 = arith.constant 0 : index
    %c0_106 = arith.constant 0 : index
    %174 = vector.load %arg11[%c0_103, %c0_104, %c0_105, %c0_106] : memref<1x8x16x8xf32, #tpu.memory_space<vmem>>, vector<1x8x16x8xf32>
    %175 = vector.shape_cast %174 : vector<1x8x16x8xf32> to vector<8x16x8xf32>
    %176 = vector.shape_cast %173 : vector<8x16x8xf32> to vector<1x8x16x8xf32>
    tpu.vector_store %arg11[%c0_103, %c0_104, %c0_105, %c0_106], %176 {strides = array<i32>} : memref<1x8x16x8xf32, #tpu.memory_space<vmem>>, vector<1x8x16x8xf32>,
    return
  }
  func.func @transform_0(%arg0: i32, %arg1: i32) -> (i32, i32, i32, i32) {
    %c0_i32 = arith.constant 0 : i32
    %c0_i32_0 = arith.constant 0 : i32
    %c0_i32_1 = arith.constant 0 : i32
    return %arg0, %arg1, %c0_i32, %c0_i32_0 : i32, i32, i32, i32
  }
  func.func @transform_1(%arg0: i32, %arg1: i32) -> (i32, i32, i32, i32) {
    %c4_i32 = arith.constant 4 : i32
    %0 = arith.muli %arg1, %c4_i32 : i32
    %c1_i32 = arith.constant 1 : i32
    %1 = arith.subi %0, %c1_i32 : i32
    %c0_i32 = arith.constant 0 : i32
    %2 = arith.maxsi %1, %c0_i32 : i32
    %c0_i32_0 = arith.constant 0 : i32
    %c0_i32_1 = arith.constant 0 : i32
    %c0_i32_2 = arith.constant 0 : i32
    return %arg0, %2, %c0_i32_0, %c0_i32_1 : i32, i32, i32, i32
  }
  func.func @transform_2(%arg0: i32, %arg1: i32) -> (i32, i32, i32, i32) {
    %c1_i32 = arith.constant 1 : i32
    %0 = arith.addi %arg1, %c1_i32 : i32
    %c4_i32 = arith.constant 4 : i32
    %1 = arith.muli %0, %c4_i32 : i32
    %c7_i32 = arith.constant 7 : i32
    %2 = arith.minsi %1, %c7_i32 : i32
    %c0_i32 = arith.constant 0 : i32
    %c0_i32_0 = arith.constant 0 : i32
    %c0_i32_1 = arith.constant 0 : i32
    return %arg0, %2, %c0_i32, %c0_i32_0 : i32, i32, i32, i32
  }
  func.func @transform_3(%arg0: i32, %arg1: i32) -> (i32, i32, i32) {
    %c0_i32 = arith.constant 0 : i32
    %c0_i32_0 = arith.constant 0 : i32
    %c0_i32_1 = arith.constant 0 : i32
    %c0_i32_2 = arith.constant 0 : i32
    return %c0_i32, %c0_i32_0, %c0_i32_1 : i32, i32, i32
  }
  func.func @transform_4(%arg0: i32, %arg1: i32) -> (i32, i32) {
    %c0_i32 = arith.constant 0 : i32
    %c0_i32_0 = arith.constant 0 : i32
    %c0_i32_1 = arith.constant 0 : i32
    return %c0_i32, %c0_i32_0 : i32, i32
  }
  func.func @transform_5(%arg0: i32, %arg1: i32) -> (i32, i32) {
    %c0_i32 = arith.constant 0 : i32
    %c0_i32_0 = arith.constant 0 : i32
    %c0_i32_1 = arith.constant 0 : i32
    return %c0_i32, %c0_i32_0 : i32, i32
  }
  func.func @transform_6(%arg0: i32, %arg1: i32) -> (i32, i32, i32) {
    %c0_i32 = arith.constant 0 : i32
    %c0_i32_0 = arith.constant 0 : i32
    %c0_i32_1 = arith.constant 0 : i32
    %c0_i32_2 = arith.constant 0 : i32
    return %c0_i32, %c0_i32_0, %c0_i32_1 : i32, i32, i32
  }
  func.func @transform_7(%arg0: i32, %arg1: i32) -> (i32, i32) {
    %c0_i32 = arith.constant 0 : i32
    %c0_i32_0 = arith.constant 0 : i32
    %c0_i32_1 = arith.constant 0 : i32
    return %c0_i32, %c0_i32_0 : i32, i32
  }
  func.func @transform_8(%arg0: i32, %arg1: i32) -> (i32, i32) {
    %c0_i32 = arith.constant 0 : i32
    %c0_i32_0 = arith.constant 0 : i32
    %c0_i32_1 = arith.constant 0 : i32
    return %c0_i32, %c0_i32_0 : i32, i32
  }
  func.func @transform_9(%arg0: i32, %arg1: i32) -> (i32, i32, i32, i32) {
    %c0_i32 = arith.constant 0 : i32
    %c0_i32_0 = arith.constant 0 : i32
    %c0_i32_1 = arith.constant 0 : i32
    return %arg0, %arg1, %c0_i32, %c0_i32_0 : i32, i32, i32, i32
  }
}

</mosaic_0001>

<bundles_post_ra>
// kernel: double_conv.1
= control target key start
LH: loop header
LB: loop body
LE: loop exit
PB: predicated region body
PF: predicated region fallthrough
CT: control target
= control target key end

     0   :  { %s2634_s30 = smov 0   ;;  %s2636_s10 = smov 0   ;;  %s3465_s0 = inlined_call_operand.vmem [shape: f32[2,16,16,4], index: 0, kind: input, shape index: {}, may-alias: {0,1,2}]   ;;  %s3466_s1 = inlined_call_operand.vmem [shape: f32[2,16,16,4], index: 1, kind: input, shape index: {}, may-alias: {0,1,2}]   ;;  %s3467_s2 = inlined_call_operand.vmem [shape: f32[2,16,16,4], index: 2, kind: input, shape index: {}, may-alias: {0,1,2}]   ;;  %s3468_s3 = inlined_call_operand.vmem [shape: f32[3,3,4], index: 3, kind: input, shape index: {}]   ;;  %s3469_s4 = inlined_call_operand.vmem [shape: f32[4,8], index: 4, kind: input, shape index: {}]   ;;  %s3470_s5 = inlined_call_operand.vmem [shape: f32[1,8], index: 5, kind: input, shape index: {}]   ;;  %s3471_s6 = inlined_call_operand.vmem [shape: f32[3,3,8], index: 6, kind: input, shape index: {}]   ;;  %s3472_s7 = inlined_call_operand.vmem [shape: f32[8,8], index: 7, kind: input, shape index: {}]   ;;  %s3473_s8 = inlined_call_operand.vmem [shape: f32[1,8], index: 8, kind: input, shape index: {}]   ;;  %s3474_s9 = inlined_call_operand.vmem [shape: f32[2,16,16,8], index: 9, kind: output, shape index: {}]  }
   0x1   :  { %3475 = sst [smem:[#allocation4_spill]] %s3465_s0  ;;  %s2638_s11 = smov 0  }
   0x2   :  { %3476 = sst [smem:[#allocation5_spill]] %s3474_s9  ;;  %s2640_s12 = smov 0  }
   0x3   :  { %s2642_s13 = smov 0  }
   0x4 LB: > { %s28_s14 = sadd.s32 1, %s2569_s11  ;;  %s31_s15 = sadd.s32 1, %s2573_s12  ;;  %s2577_s13 = sphi %s2642_s13, %s19_s13   ;;  %s2573_s12 = sphi %s2640_s12, %s3483_s12   ;;  %s2569_s11 = sphi %s2638_s11, %s3482_s11   ;;  %s2565_s10 = sphi %s2636_s10, %s3481_s10   ;;  %s2561_s30 = sphi %s2634_s30, %s3480_s30  }
   0x5   : > { %p29_p0 = scmp.ge.s32.totalorder %s28_s14, 2  ;;  %p2323_p1 = scmp.ge.s32.totalorder %s2577_s13, 1 }
   0x6   : > { %p377_p2 = scmp.lt.s32.totalorder %s2577_s13, 5 }
   0x7   : > { %s3485_s14 = smov (%p29_p0, %s28_s14), 0  ;;  %s3487_s15 = smov (!%p29_p0, %s31_s15), %s2573_s12 }
   0x8   : > { %p378_p3 = pnand %p2323_p1, %p377_p2  ;;  %p33_p4 = scmp.ge.s32.totalorder %s3487_s15, 2 }
   0x9   : > { %vm511_vm0 = vcmask (!%p378_p3), 24576   ;;  %s2324_s16 = sshll.u32 (!%p378_p3), %s2561_s30, 3  ;;  %p452_p5 = scmp.lt.s32.totalorder (!%p378_p3), %s2565_s10, 1  ;;  %v2579_v0 = vmov (!%p378_p3), 0.0   ;;  %vm553_vm1 = vcmask (!%p378_p3), 31744  }
   0xa   : > { %s3489_s15 = smov (%p33_p4, %s3487_s15), 0  ;;  %381 = sbr.rel (%p378_p3) target bundleno = 687 (0x2af), region = 56 }
   0xb   : > { %512 = vst.msk [vmem:[#allocation2] sm:$0x1] (!%p378_p3), %vm511_vm0, %v2579_v0  ;;  %513 = vst.msk [vmem:[#allocation2 + $0x18] sm:$0x1] (!%p378_p3), %vm511_vm0, %v2579_v0  ;;  %p454_p6 = scmp.lt.s32.totalorder (!%p378_p3), %s2324_s16, 15  ;;  %s2328_s17 = sshll.u32 (!%p378_p3), %s2561_s30, 2 }
   0xc   : > { %514 = vst.msk [vmem:[#allocation2 + $0x30] sm:$0x1] (!%p378_p3), %vm511_vm0, %v2579_v0  ;;  %515 = vst.msk [vmem:[#allocation2 + $0x48] sm:$0x1] (!%p378_p3), %vm511_vm0, %v2579_v0  ;;  %s2329_s19 = sadd.s32 (!%p378_p3), 4294967295, %s2328_s17  ;;  %s2395_s22 = sadd.s32 (!%p378_p3), 4, %s2328_s17 }
   0xd   : > { %516 = vst.msk [vmem:[#allocation2 + $0x60] sm:$0x1] (!%p378_p3), %vm511_vm0, %v2579_v0  ;;  %517 = vst.msk [vmem:[#allocation2 + $0x78] sm:$0x1] (!%p378_p3), %vm511_vm0, %v2579_v0  ;;  %p464_p7 = scmp.gt.s32.totalorder (!%p378_p3), %s2329_s19, 0  ;;  %p483_p8 = scmp.lt.s32.totalorder (!%p378_p3), %s2395_s22, 7 }
   0xe   : > { %518 = vst.msk [vmem:[#allocation2 + $0x90] sm:$0x1] (!%p378_p3), %vm511_vm0, %v2579_v0  ;;  %519 = vst.msk [vmem:[#allocation2 + $0xa8] sm:$0x1] (!%p378_p3), %vm511_vm0, %v2579_v0  ;;  %s3477_s0 = sld [smem:[#allocation4_spill]] (!%p378_p3)  ;;  %s3478_s9 = sld [smem:[#allocation5_spill]] (!%p378_p3) }
   0xf   : > { %520 = vst.msk [vmem:[#allocation2 + $0xc0] sm:$0x1] (!%p378_p3), %vm511_vm0, %v2579_v0  ;;  %521 = vst.msk [vmem:[#allocation2 + $0xd8] sm:$0x1] (!%p378_p3), %vm511_vm0, %v2579_v0  ;;  %p2343_p11 = scmp.le.s32.totalorder (!%p378_p3), %s2561_s30, 0 }
  0x10   : > { %522 = vst.msk [vmem:[#allocation2 + $0xf0] sm:$0x1] (!%p378_p3), %vm511_vm0, %v2579_v0  ;;  %523 = vst.msk [vmem:[#allocation2 + $0x108] sm:$0x1] (!%p378_p3), %vm511_vm0, %v2579_v0 }
  0x11   : > { %524 = vst.msk [vmem:[#allocation2 + $0x11] sm:$0x1] %vm511_vm0, %v2579_v0  ;;  %525 = vst.msk [vmem:[#allocation2 + $0x29] sm:$0x1] %vm511_vm0, %v2579_v0  ;;  %s3491_s10 = smov (!%p452_p5, %s2565_s10), 1  ;;  %s3493_s16 = smov (!%p454_p6, %s2324_s16), 15 }
  0x12   : > { %526 = vst.msk [vmem:[#allocation2 + $0x41] sm:$0x1] %vm511_vm0, %v2579_v0  ;;  %527 = vst.msk [vmem:[#allocation2 + $0x59] sm:$0x1] %vm511_vm0, %v2579_v0  ;;  %s2726_s18 = sshll.u32 %s3491_s10, 5  ;;  %s2325_s20 = sshll.u32 %s3493_s16, 1 }
  0x13   : > { %528 = vst.msk [vmem:[#allocation2 + $0x71] sm:$0x1] %vm511_vm0, %v2579_v0  ;;  %529 = vst.msk [vmem:[#allocation2 + $0x89] sm:$0x1] %vm511_vm0, %v2579_v0  ;;  %s458_s21 = sadd.s32 %s2726_s18, %s2325_s20  ;;  %s3495_s19 = smov (!%p464_p7, %s2329_s19), 0 }
  0x14   : > { %530 = vst.msk [vmem:[#allocation2 + $0xa1] sm:$0x1] %vm511_vm0, %v2579_v0  ;;  %531 = vst.msk [vmem:[#allocation2 + $0xb9] sm:$0x1] %vm511_vm0, %v2579_v0  ;;  %s2327_s23 = sshll.u32 %s458_s21, 3  ;;  %s3497_s22 = smov (!%p483_p8, %s2395_s22), 7 }
  0x15   : > { %532 = vst.msk [vmem:[#allocation2 + $0xd1] sm:$0x1] %vm511_vm0, %v2579_v0  ;;  %533 = vst.msk [vmem:[#allocation2 + $0xe9] sm:$0x1] %vm511_vm0, %v2579_v0  ;;  %s2732_s26 = scalar_lea.vmem %s3477_s0, %s2327_s23  ;;  %s2737_s29 = scalar_lea.vmem %s3478_s9, %s2327_s23 }
  0x16   : > { %534 = vst.msk [vmem:[#allocation2 + $0x101] sm:$0x1] %vm511_vm0, %v2579_v0  ;;  %535 = vst.msk [vmem:[#allocation2 + $0x119] sm:$0x1] %vm511_vm0, %v2579_v0  ;;  %v536_v1 = vld [vmem:[%s2732_s26] sm:$0xff]  ;;  %v537_v2 = vld [vmem:[%s2732_s26 + $0x8] sm:$0xff] }
  0x17   : > { %v538_v3 = vld [vmem:[%s2732_s26 + $0x10] sm:$0xff]  ;;  %554 = vst.msk [vmem:[#allocation2 + $0x31] sm:$0xff] %vm553_vm1, %v536_v1  ;;  %555 = vst.msk [vmem:[#allocation2 + $0x39] sm:$0xff] %vm553_vm1, %v537_v2  ;;  %v539_v4 = vld [vmem:[%s2732_s26 + $0x18] sm:$0xff]  ;;  %s2330_s10 = sshll.u32 %s3495_s19, 1  ;;  %s2335_s17 = sshll.u32 %s3497_s22, 1 }
  0x18   : > { %556 = vst.msk [vmem:[#allocation2 + $0x49] sm:$0xff] %vm553_vm1, %v538_v3  ;;  %v540_v5 = vld [vmem:[%s2732_s26 + $0x20] sm:$0xff]  ;;  %v541_v6 = vld [vmem:[%s2732_s26 + $0x28] sm:$0xff]  ;;  %557 = vst.msk [vmem:[#allocation2 + $0x51] sm:$0xff] %vm553_vm1, %v539_v4  ;;  %p2759_p9 = scmp.lt.s32.totalorder %s2330_s10, 15  ;;  %p488_p10 = scmp.lt.s32.totalorder %s2335_s17, 15 }
  0x19   : > { %558 = vst.msk [vmem:[#allocation2 + $0x61] sm:$0xff] %vm553_vm1, %v540_v5  ;;  %559 = vst.msk [vmem:[#allocation2 + $0x69] sm:$0xff] %vm553_vm1, %v541_v6  ;;  %v542_v7 = vld [vmem:[%s2732_s26 + $0x30] sm:$0xff]  ;;  %v543_v8 = vld [vmem:[%s2732_s26 + $0x38] sm:$0xff]  ;;  %573 = sbr.rel (%p2343_p11) target bundleno = 34 (0x22), region = 60 }
  0x1a   : > { %v544_v9 = vld [vmem:[%s2732_s26 + $0x40] sm:$0xff]  ;;  %560 = vst.msk [vmem:[#allocation2 + $0x79] sm:$0xff] %vm553_vm1, %v542_v7  ;;  %561 = vst.msk [vmem:[#allocation2 + $0x81] sm:$0xff] %vm553_vm1, %v543_v8  ;;  %v545_v10 = vld [vmem:[%s2732_s26 + $0x48] sm:$0xff]  ;;  %s3499_s10 = smov (!%p2759_p9, %s2330_s10), 15  ;;  %s3501_s17 = smov (!%p488_p10, %s2335_s17), 15 }
  0x1b   : > { %562 = vst.msk [vmem:[#allocation2 + $0x91] sm:$0xff] %vm553_vm1, %v544_v9  ;;  %v546_v11 = vld [vmem:[%s2732_s26 + $0x50] sm:$0xff]  ;;  %v547_v12 = vld [vmem:[%s2732_s26 + $0x58] sm:$0xff]  ;;  %563 = vst.msk [vmem:[#allocation2 + $0x99] sm:$0xff] %vm553_vm1, %v545_v10  ;;  %s2331_s19 = sshll.u32 %s3499_s10, 1  ;;  %s2336_s21 = sshll.u32 %s3501_s17, 1 }
  0x1c   : > { %564 = vst.msk [vmem:[#allocation2 + $0xa9] sm:$0xff] %vm553_vm1, %v546_v11  ;;  %565 = vst.msk [vmem:[#allocation2 + $0xb1] sm:$0xff] %vm553_vm1, %v547_v12  ;;  %v548_v13 = vld [vmem:[%s2732_s26 + $0x60] sm:$0xff]  ;;  %v549_v14 = vld [vmem:[%s2732_s26 + $0x68] sm:$0xff]  ;;  %s473_s20 = sadd.s32 %s2331_s19, %s2726_s18  ;;  %s492_s23 = sadd.s32 %s2336_s21, %s2726_s18 }
  0x1d   : > { %v550_v15 = vld [vmem:[%s2732_s26 + $0x70] sm:$0xff]  ;;  %566 = vst.msk [vmem:[#allocation2 + $0xc1] sm:$0xff] %vm553_vm1, %v548_v13  ;;  %567 = vst.msk [vmem:[#allocation2 + $0xc9] sm:$0xff] %vm553_vm1, %v549_v14  ;;  %v551_v16 = vld [vmem:[%s2732_s26 + $0x78] sm:$0xff]  ;;  %s2333_s22 = sshll.u32 %s473_s20, 3  ;;  %s2338_s28 = sshll.u32 %s492_s23, 3 }
  0x1e   : > { %568 = vst.msk [vmem:[#allocation2 + $0xd9] sm:$0xff] %vm553_vm1, %v550_v15  ;;  %569 = vst.msk [vmem:[#allocation2 + $0xe1] sm:$0xff] %vm553_vm1, %v551_v16  ;;  %s475_s27 = scalar_lea.vmem %s3466_s1, %s2333_s22  ;;  %s494_s9 = scalar_lea.vmem %s3467_s2, %s2338_s28 }
  0x1f   : > { %v574_v17 = vld [vmem:[%s475_s27] sm:$0xff] (!%p2343_p11)  ;;  %v575_v18 = vld [vmem:[%s475_s27 + $0x8] sm:$0xff] (!%p2343_p11)  ;;  %v576_v19 = vld [vmem:[%s475_s27 + $0x10] sm:$0xff] (!%p2343_p11) }
  0x20   : > { %578 = vst.msk [vmem:[#allocation2 + $0x1] sm:$0xff] %vm553_vm1, %v574_v17  ;;  %579 = vst.msk [vmem:[#allocation2 + $0x9] sm:$0xff] %vm553_vm1, %v575_v18  ;;  %v577_v20 = vld [vmem:[%s475_s27 + $0x18] sm:$0xff] }
  0x21   : > { %580 = vst.msk [vmem:[#allocation2 + $0x19] sm:$0xff] %vm553_vm1, %v576_v19  ;;  %581 = vst.msk [vmem:[#allocation2 + $0x21] sm:$0xff] %vm553_vm1, %v577_v20 }
  0x22 PF: > { %p2344_p12 = scmp.ne.s32.totalorder %s2561_s30, 0 }
  0x23   : > { %v2580_v21 = vmov (!%p2344_p12), 0.0  }
  0x24   : > { %585 = sbr.rel (%p2344_p12) target bundleno = 43 (0x2b), region = 64  ;;  %586 = vst.msk [vmem:[#allocation2 + $0x1] sm:$0xff] (!%p2344_p12), %vm553_vm1, %v2580_v21  ;;  %587 = vst.msk [vmem:[#allocation2 + $0x9] sm:$0xff] (!%p2344_p12), %vm553_vm1, %v2580_v21 }
  0x25   : > { %588 = vst.msk [vmem:[#allocation2 + $0x19] sm:$0xff] (!%p2344_p12), %vm553_vm1, %v2580_v21  ;;  %589 = vst.msk [vmem:[#allocation2 + $0x21] sm:$0xff] (!%p2344_p12), %vm553_vm1, %v2580_v21 }
  0x2b PF: > { %p2345_p13 = scmp.ge.s32.totalorder %s2561_s30, 1 }
  0x2c   : > { %v594_v22 = vld [vmem:[%s494_s9] sm:$0xff] (!%p2345_p13)  ;;  %v595_v23 = vld [vmem:[%s494_s9 + $0x8] sm:$0xff] (!%p2345_p13)  ;;  %v596_v24 = vld [vmem:[%s494_s9 + $0x10] sm:$0xff] (!%p2345_p13) }
  0x2d   : > { %593 = sbr.rel (%p2345_p13) target bundleno = 52 (0x34), region = 68  ;;  %599 = vst.msk [vmem:[#allocation2 + $0xf1] sm:$0xff] (!%p2345_p13), %vm553_vm1, %v594_v22  ;;  %600 = vst.msk [vmem:[#allocation2 + $0xf9] sm:$0xff] (!%p2345_p13), %vm553_vm1, %v595_v23  ;;  %v597_v25 = vld [vmem:[%s494_s9 + $0x18] sm:$0xff] (!%p2345_p13) }
  0x2e   : > { %601 = vst.msk [vmem:[#allocation2 + $0x109] sm:$0xff] (!%p2345_p13), %vm553_vm1, %v596_v24  ;;  %602 = vst.msk [vmem:[#allocation2 + $0x111] sm:$0xff] (!%p2345_p13), %vm553_vm1, %v597_v25 }
  0x34 PF: > { %p2346_p0 = scmp.ne.s32.totalorder %s2561_s30, 1 }
  0x35   : > { %v2581_v26 = vmov (!%p2346_p0), 0.0  }
  0x36   : > { %606 = sbr.rel (%p2346_p0) target bundleno = 61 (0x3d), region = 72  ;;  %608 = vst.msk [vmem:[#allocation2 + $0xf1] sm:$0xff] (!%p2346_p0), %vm553_vm1, %v2581_v26  ;;  %609 = vst.msk [vmem:[#allocation2 + $0xf9] sm:$0xff] (!%p2346_p0), %vm553_vm1, %v2581_v26 }
  0x37   : > { %610 = vst.msk [vmem:[#allocation2 + $0x109] sm:$0xff] (!%p2346_p0), %vm553_vm1, %v2581_v26  ;;  %611 = vst.msk [vmem:[#allocation2 + $0x111] sm:$0xff] (!%p2346_p0), %vm553_vm1, %v2581_v26 }
  0x3d PF: > { %v1172_v27 = vld [vmem:[%s3469_s4] sm:$0xf]  ;;  %vm1240_vm2 = vcmask 1043456   ;;  %v635_v28 = vlaneseq  ;;  %v613_v31 = vld [vmem:[%s3468_s3 + $0x4] sm:$0x7]  ;;  %v788_v42 = vld [vmem:[#allocation2 + $0x18] sm:$0xff] }
  0x3e   : > { %2434 = vmatprep.subr.msk.mxu0 %vm1240_vm2, %v1172_v27  ;;  %2492 = vmatprep.subr.msk.mxu1 %vm1240_vm2, %v1172_v27  ;;  %v612_v30 = vld [vmem:[%s3468_s3] sm:$0x7]  ;;  %v614_v32 = vld [vmem:[%s3468_s3 + $0x8] sm:$0x7]  ;;  %v980_v59 = vld [vmem:[#allocation2 + $0x30] sm:$0xff]  ;;  %vm1429_vm3 = vcmask 57344  }
  0x3f   : > { %2435 = vmatpush3.msk.msra.mxu0 %vm1240_vm2, %v1172_v27  ;;  %v636_v29 = vshrl.u32 %v635_v28, 7  ;;  %2493 = vmatpush3.msk.msra.mxu1 %vm1240_vm2, %v1172_v27  ;;  %v615_v36 = vld [vmem:[#allocation2] sm:$0xff]  ;;  %v616_v47 = vld [vmem:[#allocation2 + $0x8] sm:$0xff]  ;;  %v1044_v3 = vld [vmem:[#allocation2 + $0x31] sm:$0xff]  ;;  %1430 = vst.msk [vmem:[#allocation3] sm:$0x1] %vm1429_vm3, %v2579_v0 }
  0x40   : > { %v659_v37 = vld [vmem:[#allocation2 + $0x1] sm:$0xff]  ;;  %v660_v48 = vld [vmem:[#allocation2 + $0x9] sm:$0xff]  ;;  %v852_v57 = vld [vmem:[#allocation2 + $0x19] sm:$0xff]  ;;  %1431 = vst.msk [vmem:[#allocation3 + $0x18] sm:$0x1] %vm1429_vm3, %v2579_v0  ;;  %vm1450_vm4 = vcmask 64512  }
  0x41   : > { %v2827_v33 = vsub.s32 0, %v636_v29  ;;  %v2829_v34 = vsub.s32 1, %v636_v29  ;;  %v2831_v35 = vsub.s32 2, %v636_v29  ;;  %v723_v38 = vld [vmem:[#allocation2 + $0x2] sm:$0xff]  ;;  %v724_v53 = vld [vmem:[#allocation2 + $0xa] sm:$0xff]  ;;  %v916_v58 = vld [vmem:[#allocation2 + $0x1a] sm:$0xff] }
  0x42   : > { %v789_v55 = vld [vmem:[#allocation2 + $0x20] sm:$0xff]  ;;  %v1108_v11 = vld [vmem:[#allocation2 + $0x32] sm:$0xff]  ;;  %1432 = vst.msk [vmem:[#allocation3 + $0x30] sm:$0x1] %vm1429_vm3, %v2579_v0  ;;  %1433 = vst.msk [vmem:[#allocation3 + $0x48] sm:$0x1] %vm1429_vm3, %v2579_v0 }
  0x43   : > { %v2834_v39 = vrot.slane %v612_v30, %v2827_v33  ;;  %v2837_v40 = vrot.slane %v612_v30, %v2829_v34  ;;  %v2840_v41 = vrot.slane %v612_v30, %v2831_v35  ;;  %v2843_v43 = vrot.slane %v613_v31, %v2827_v33  ;;  %v853_v9 = vld [vmem:[#allocation2 + $0x21] sm:$0xff]  ;;  %v981_v19 = vld [vmem:[#allocation2 + $0x38] sm:$0xff]  ;;  %1434 = vst.msk [vmem:[#allocation3 + $0x60] sm:$0x1] %vm1429_vm3, %v2579_v0 }
  0x44   : > { %v2846_v44 = vrot.slane %v613_v31, %v2829_v34  ;;  %v2849_v45 = vrot.slane %v613_v31, %v2831_v35  ;;  %v2852_v46 = vrot.slane %v614_v32, %v2827_v33  ;;  %v2858_v52 = vrot.slane %v614_v32, %v2829_v34  ;;  %v917_v10 = vld [vmem:[#allocation2 + $0x22] sm:$0xff]  ;;  %v1045_v20 = vld [vmem:[#allocation2 + $0x39] sm:$0xff]  ;;  %1435 = vst.msk [vmem:[#allocation3 + $0x78] sm:$0x1] %vm1429_vm3, %v2579_v0 }
  0x45   : > { %v639_v49 = vmul.f32 %v2834_v39, %v615_v36  ;;  %v683_v50 = vmul.f32 %v2837_v40, %v659_v37  ;;  %v747_v51 = vmul.f32 %v2840_v41, %v723_v38  ;;  %v812_v54 = vmul.f32 %v2843_v43, %v788_v42  ;;  %v1109_v24 = vld [vmem:[#allocation2 + $0x3a] sm:$0xff]  ;;  %1436 = vst.msk [vmem:[#allocation3 + $0x90] sm:$0x1] %vm1429_vm3, %v2579_v0 }
  0x46   : > { %v2862_v60 = vrot.slane %v614_v32, %v2831_v35  ;;  %v640_v61 = vmul.f32 %v2834_v39, %v616_v47  ;;  %v684_v62 = vmul.f32 %v2837_v40, %v660_v48  ;;  %v876_v63 = vmul.f32 %v2846_v44, %v852_v57  ;;  %v2883_v32 = vld [vmem:[#allocation2 + $0x48] sm:$0xff]  ;;  %1437 = vst.msk [vmem:[#allocation3 + $0xa8] sm:$0x1] %vm1429_vm3, %v2579_v0 }
  0x47   : > { %v703_v56 = vadd.f32 %v683_v50, %v639_v49  ;;  %v940_v1 = vmul.f32 %v2849_v45, %v916_v58  ;;  %v1004_v2 = vmul.f32 %v2852_v46, %v980_v59  ;;  %v748_v4 = vmul.f32 %v2840_v41, %v724_v53  ;;  %v1046_v50 = vld [vmem:[#allocation2 + $0x49] sm:$0xff]  ;;  %1438 = vst.msk [vmem:[#allocation3 + $0xc0] sm:$0x1] %vm1429_vm3, %v2579_v0 }
  0x48   : > { %v1068_v6 = vmul.f32 %v2858_v52, %v1044_v3  ;;  %v704_v7 = vadd.f32 %v684_v62, %v640_v61  ;;  %v813_v8 = vmul.f32 %v2843_v43, %v789_v55  ;;  %v877_v12 = vmul.f32 %v2846_v44, %v853_v9  ;;  %1439 = vst.msk [vmem:[#allocation3 + $0xd8] sm:$0x1] %vm1429_vm3, %v2579_v0 }
  0x49   : > { %v767_v5 = vadd.f32 %v747_v51, %v703_v56  ;;  %v941_v13 = vmul.f32 %v2849_v45, %v917_v10  ;;  %v641_v14 = vmul.f32 %v788_v42, %v2834_v39  ;;  %v685_v15 = vmul.f32 %v852_v57, %v2837_v40  ;;  %1440 = vst.msk [vmem:[#allocation3 + $0x11] sm:$0x1] %vm1429_vm3, %v2579_v0 }
  0x4a   : > { %v1132_v17 = vmul.f32 %v2862_v60, %v1108_v11  ;;  %v768_v18 = vadd.f32 %v748_v4, %v704_v7  ;;  %v749_v21 = vmul.f32 %v916_v58, %v2840_v41  ;;  %v1005_v22 = vmul.f32 %v2852_v46, %v981_v19  ;;  %1441 = vst.msk [vmem:[#allocation3 + $0x29] sm:$0x1] %vm1429_vm3, %v2579_v0 }
  0x4b   : > { %v832_v16 = vadd.f32 %v812_v54, %v767_v5  ;;  %v1069_v23 = vmul.f32 %v2858_v52, %v1045_v20  ;;  %v705_v25 = vadd.f32 %v685_v15, %v641_v14  ;;  %v814_v26 = vmul.f32 %v980_v59, %v2843_v43  ;;  %v1110_v54 = vld [vmem:[#allocation2 + $0x4a] sm:$0xff]  ;;  %1442 = vst.msk [vmem:[#allocation3 + $0x41] sm:$0x1] %vm1429_vm3, %v2579_v0 }
  0x4c   : > { %v833_v28 = vadd.f32 %v813_v8, %v768_v18  ;;  %v1133_v29 = vmul.f32 %v2862_v60, %v1109_v24  ;;  %v878_v30 = vmul.f32 %v1044_v3, %v2846_v44  ;;  %v642_v36 = vmul.f32 %v789_v55, %v2834_v39  ;;  %1443 = vst.msk [vmem:[#allocation3 + $0x59] sm:$0x1] %vm1429_vm3, %v2579_v0 }
  0x4d   : > { %v896_v27 = vadd.f32 %v876_v63, %v832_v16  ;;  %v769_v31 = vadd.f32 %v749_v21, %v705_v25  ;;  %v686_v37 = vmul.f32 %v853_v9, %v2837_v40  ;;  %v750_v38 = vmul.f32 %v917_v10, %v2840_v41  ;;  %1444 = vst.msk [vmem:[#allocation3 + $0x71] sm:$0x1] %vm1429_vm3, %v2579_v0 }
  0x4e   : > { %v897_v47 = vadd.f32 %v877_v12, %v833_v28  ;;  %v942_v48 = vmul.f32 %v1108_v11, %v2849_v45  ;;  %v1006_v49 = vmul.f32 %v2852_v46, %v2883_v32  ;;  %v1070_v53 = vmul.f32 %v2858_v52, %v1046_v50  ;;  %1445 = vst.msk [vmem:[#allocation3 + $0x89] sm:$0x1] %vm1429_vm3, %v2579_v0 }
  0x4f   : > { %v960_v42 = vadd.f32 %v940_v1, %v896_v27  ;;  %v834_v51 = vadd.f32 %v814_v26, %v769_v31  ;;  %v706_v56 = vadd.f32 %v686_v37, %v642_v36  ;;  %v815_v57 = vmul.f32 %v981_v19, %v2843_v43  ;;  %v1111_v31 = vld [vmem:[#allocation2 + $0x52] sm:$0xff]  ;;  %1446 = vst.msk [vmem:[#allocation3 + $0xa1] sm:$0x1] %vm1429_vm3, %v2579_v0 }
  0x50   : > { %v961_v58 = vadd.f32 %v941_v13, %v897_v47  ;;  %v1134_v61 = vmul.f32 %v2862_v60, %v1110_v54  ;;  %v879_v62 = vmul.f32 %v1045_v20, %v2846_v44  ;;  %v643_v4 = vmul.f32 %v980_v59, %v2834_v39  ;;  %v1047_v13 = vld [vmem:[#allocation2 + $0x51] sm:$0xff]  ;;  %1447 = vst.msk [vmem:[#allocation3 + $0xb9] sm:$0x1] %vm1429_vm3, %v2579_v0 }
  0x51   : > { %v1024_v55 = vadd.f32 %v1004_v2, %v960_v42  ;;  %v898_v63 = vadd.f32 %v878_v30, %v834_v51  ;;  %v770_v1 = vadd.f32 %v750_v38, %v706_v56  ;;  %v687_v5 = vmul.f32 %v1044_v3, %v2837_v40  ;;  %v983_v2 = vld [vmem:[#allocation2 + $0x50] sm:$0xff]  ;;  %v984_v42 = vld [vmem:[#allocation2 + $0x60] sm:$0xff]  ;;  %1448 = vst.msk [vmem:[#allocation3 + $0xd1] sm:$0x1] %vm1429_vm3, %v2579_v0 }
  0x52   : > { %v1025_v8 = vadd.f32 %v1005_v22, %v961_v58  ;;  %v943_v9 = vmul.f32 %v1109_v24, %v2849_v45  ;;  %v751_v10 = vmul.f32 %v1108_v11, %v2840_v41  ;;  %v816_v16 = vmul.f32 %v2883_v32, %v2843_v43  ;;  %1449 = vst.msk [vmem:[#allocation3 + $0xe9] sm:$0x1] %vm1429_vm3, %v2579_v0 }
  0x53   : > { %v1088_v7 = vadd.f32 %v1068_v6, %v1024_v55  ;;  %v962_v12 = vadd.f32 %v942_v48, %v898_v63  ;;  %v835_v14 = vadd.f32 %v815_v57, %v770_v1  ;;  %v707_v15 = vadd.f32 %v687_v5, %v643_v4 }
  0x54   : > { %v1089_v21 = vadd.f32 %v1069_v23, %v1025_v8  ;;  %v1007_v59 = vmul.f32 %v2852_v46, %v983_v2  ;;  %v1071_v3 = vmul.f32 %v2858_v52, %v1047_v13  ;;  %v880_v26 = vmul.f32 %v1046_v50, %v2846_v44 }
  0x55   : > { %v1152_v18 = vadd.f32 %v1132_v17, %v1088_v7  ;;  %v1026_v6 = vadd.f32 %v1006_v49, %v962_v12  ;;  %v899_v22 = vadd.f32 %v879_v62, %v835_v14  ;;  %v771_v25 = vadd.f32 %v751_v10, %v707_v15  ;;  %v1112_v62 = vld [vmem:[#allocation2 + $0x62] sm:$0xff] }
  0x56   : > { %v1153_v11 = vadd.f32 %v1133_v29, %v1089_v21  ;;  %v944_v27 = vmul.f32 %v1110_v54, %v2849_v45  ;;  %v644_v28 = vmul.f32 %v981_v19, %v2834_v39  ;;  %v688_v30 = vmul.f32 %v1045_v20, %v2837_v40  ;;  %v1048_v20 = vld [vmem:[#allocation2 + $0x61] sm:$0xff] }
  0x57   : > { %2436 = vmatprep.mubr.msk.f32.mxu0 %vm553_vm1, %v1152_v18  ;;  %v1090_v17 = vadd.f32 %v1070_v53, %v1026_v6  ;;  %v963_v23 = vadd.f32 %v943_v9, %v899_v22  ;;  %v836_v36 = vadd.f32 %v816_v16, %v771_v25  ;;  %v752_v37 = vmul.f32 %v1109_v24, %v2840_v41  ;;  %v985_v9 = vld [vmem:[#allocation2 + $0x68] sm:$0xff] }
  0x58   : > { %2437 = vmatmul.mubr.msk.f32.vlgmr.msra.gmra.mrb[0].mxu0 %vm553_vm1, %v1153_v11  ;;  %v1135_v38 = vmul.f32 %v2862_v60, %v1111_v31  ;;  %v708_v47 = vadd.f32 %v688_v30, %v644_v28  ;;  %v817_v29 = vmul.f32 %v983_v2, %v2843_v43  ;;  %v1008_v19 = vmul.f32 %v2852_v46, %v984_v42  ;;  %v1049_v16 = vld [vmem:[#allocation2 + $0x69] sm:$0xff] }
  0x59   : > { %v1154_v48 = vadd.f32 %v1134_v61, %v1090_v17  ;;  %v1027_v49 = vadd.f32 %v1007_v59, %v963_v23  ;;  %v900_v51 = vadd.f32 %v880_v26, %v836_v36  ;;  %v1072_v53 = vmul.f32 %v2858_v52, %v1048_v20  ;;  %v1113_v18 = vld [vmem:[#allocation2 + $0x6a] sm:$0xff] }
  0x5a   : > { %v772_v56 = vadd.f32 %v752_v37, %v708_v47  ;;  %v881_v57 = vmul.f32 %v1047_v13, %v2846_v44  ;;  %v645_v24 = vmul.f32 %v2883_v32, %v2834_v39  ;;  %v689_v61 = vmul.f32 %v1046_v50, %v2837_v40  ;;  %v1050_v37 = vld [vmem:[#allocation2 + $0x79] sm:$0xff] }
  0x5b   : > { %2439 = vmatprep.mubr.msk.f32.mxu0 %vm553_vm1, %v1154_v48  ;;  %v1091_v55 = vadd.f32 %v1071_v3, %v1027_v49  ;;  %v964_v58 = vadd.f32 %v944_v27, %v900_v51  ;;  %v753_v63 = vmul.f32 %v1110_v54, %v2840_v41  ;;  %v1136_v1 = vmul.f32 %v2862_v60, %v1112_v62 }
  0x5c   : > { %v837_v4 = vadd.f32 %v817_v29, %v772_v56  ;;  %v945_v5 = vmul.f32 %v1111_v31, %v2849_v45  ;;  %v709_v10 = vadd.f32 %v689_v61, %v645_v24  ;;  %v818_v32 = vmul.f32 %v984_v42, %v2843_v43 }
  0x5d   : > { %v1155_v7 = vadd.f32 %v1135_v38, %v1091_v55  ;;  %v1028_v8 = vadd.f32 %v1008_v19, %v964_v58  ;;  %v1009_v14 = vmul.f32 %v2852_v46, %v985_v9  ;;  %v882_v15 = vmul.f32 %v1048_v20, %v2846_v44  ;;  %v1114_v38 = vld [vmem:[#allocation2 + $0x7a] sm:$0xff] }
  0x5e   : > { %v901_v12 = vadd.f32 %v881_v57, %v837_v4  ;;  %v646_v50 = vmul.f32 %v983_v2, %v2834_v39  ;;  %v773_v21 = vadd.f32 %v753_v63, %v709_v10  ;;  %v690_v59 = vmul.f32 %v1047_v13, %v2837_v40  ;;  %v986_v2 = vld [vmem:[#allocation2 + $0x78] sm:$0xff]  ;;  %v1051_v4 = vld [vmem:[#allocation2 + $0x81] sm:$0xff] }
  0x5f   : > { %2440 = vmatmul.mubr.msk.f32.gmra.mrb[2].mxu0 %vm553_vm1, %v1155_v7  ;;  %v1092_v54 = vadd.f32 %v1072_v53, %v1028_v8  ;;  %v754_v3 = vmul.f32 %v1111_v31, %v2840_v41  ;;  %v1073_v22 = vmul.f32 %v2858_v52, %v1049_v16  ;;  %v1137_v25 = vmul.f32 %v2862_v60, %v1113_v18 }
  0x60   : > { %v965_v6 = vadd.f32 %v945_v5, %v901_v12  ;;  %v946_v26 = vmul.f32 %v1112_v62, %v2849_v45  ;;  %v838_v27 = vadd.f32 %v818_v32, %v773_v21  ;;  %v710_v28 = vadd.f32 %v690_v59, %v646_v50  ;;  %v1115_v50 = vld [vmem:[#allocation2 + $0x82] sm:$0xff] }
  0x61   : > { %v1156_v11 = vadd.f32 %v1136_v1, %v1092_v54  ;;  %v819_v30 = vmul.f32 %v985_v9, %v2843_v43  ;;  %v1010_v23 = vmul.f32 %v2852_v46, %v986_v2  ;;  %v883_v13 = vmul.f32 %v1049_v16, %v2846_v44  ;;  %v988_v54 = vld [vmem:[#allocation2 + $0x90] sm:$0xff] }
  0x62   : > { %v1029_v17 = vadd.f32 %v1009_v14, %v965_v6  ;;  %v647_v31 = vmul.f32 %v984_v42, %v2834_v39  ;;  %v902_v36 = vadd.f32 %v882_v15, %v838_v27  ;;  %v774_v47 = vadd.f32 %v754_v3, %v710_v28  ;;  %v987_v42 = vld [vmem:[#allocation2 + $0x80] sm:$0xff] }
  0x63   : > { %2442 = vmatprep.mubr.msk.f32.mxu0 %vm553_vm1, %v1156_v11  ;;  %v691_v29 = vmul.f32 %v1048_v20, %v2837_v40  ;;  %v755_v48 = vmul.f32 %v1112_v62, %v2840_v41  ;;  %v1074_v51 = vmul.f32 %v2858_v52, %v1050_v37  ;;  %v1138_v19 = vmul.f32 %v2862_v60, %v1114_v38  ;;  %v1116_v11 = vld [vmem:[#allocation2 + $0x92] sm:$0xff] }
  0x64   : > { %v1093_v49 = vadd.f32 %v1073_v22, %v1029_v17  ;;  %v947_v53 = vmul.f32 %v1113_v18, %v2849_v45  ;;  %v966_v56 = vadd.f32 %v946_v26, %v902_v36  ;;  %v839_v57 = vadd.f32 %v819_v30, %v774_v47  ;;  %v989_v47 = vld [vmem:[#allocation2 + $0x98] sm:$0xff] }
  0x65   : > { %v711_v24 = vadd.f32 %v691_v29, %v647_v31  ;;  %v820_v55 = vmul.f32 %v986_v2, %v2843_v43  ;;  %v1011_v61 = vmul.f32 %v2852_v46, %v987_v42  ;;  %v884_v20 = vmul.f32 %v1050_v37, %v2846_v44  ;;  %v1053_v29 = vld [vmem:[#allocation2 + $0x99] sm:$0xff] }
  0x66   : > { %v1157_v58 = vadd.f32 %v1137_v25, %v1093_v49  ;;  %v648_v62 = vmul.f32 %v985_v9, %v2834_v39  ;;  %v1030_v63 = vadd.f32 %v1010_v23, %v966_v56  ;;  %v903_v1 = vadd.f32 %v883_v13, %v839_v57  ;;  %v1117_v57 = vld [vmem:[#allocation2 + $0x9a] sm:$0xff] }
  0x67   : > { %v775_v5 = vadd.f32 %v755_v48, %v711_v24  ;;  %v692_v7 = vmul.f32 %v1049_v16, %v2837_v40  ;;  %v1075_v8 = vmul.f32 %v2858_v52, %v1051_v4  ;;  %v948_v10 = vmul.f32 %v1114_v38, %v2849_v45 }
  0x68   : > { %2443 = vmatmul.mubr.msk.f32.gmra.mrb[4].mxu0 %vm553_vm1, %v1157_v58  ;;  %v756_v32 = vmul.f32 %v1113_v18, %v2840_v41  ;;  %v821_v12 = vmul.f32 %v987_v42, %v2843_v43  ;;  %v1094_v14 = vadd.f32 %v1074_v51, %v1030_v63  ;;  %v967_v15 = vadd.f32 %v947_v53, %v903_v1  ;;  %v1052_v18 = vld [vmem:[#allocation2 + $0x91] sm:$0xff] }
  0x69   : > { %v840_v9 = vadd.f32 %v820_v55, %v775_v5  ;;  %v712_v21 = vadd.f32 %v692_v7, %v648_v62  ;;  %v1139_v59 = vmul.f32 %v2862_v60, %v1115_v50  ;;  %v1012_v16 = vmul.f32 %v2852_v46, %v988_v54  ;;  %v990_v5 = vld [vmem:[#allocation2 + $0xa8] sm:$0xff] }
  0x6a   : > { %v885_v3 = vmul.f32 %v1051_v4, %v2846_v44  ;;  %v649_v6 = vmul.f32 %v986_v2, %v2834_v39  ;;  %v1158_v22 = vadd.f32 %v1138_v19, %v1094_v14  ;;  %v1031_v25 = vadd.f32 %v1011_v61, %v967_v15 }
  0x6b   : > { %v904_v26 = vadd.f32 %v884_v20, %v840_v9  ;;  %v776_v27 = vadd.f32 %v756_v32, %v712_v21  ;;  %v1076_v28 = vmul.f32 %v2858_v52, %v1052_v18  ;;  %v1140_v30 = vmul.f32 %v2862_v60, %v1116_v11  ;;  %v1118_v9 = vld [vmem:[#allocation2 + $0xaa] sm:$0xff] }
  0x6c   : > { %v693_v17 = vmul.f32 %v1050_v37, %v2837_v40  ;;  %v757_v23 = vmul.f32 %v1114_v38, %v2840_v41  ;;  %2445 = vmatprep.mubr.msk.f32.mxu0 %vm553_vm1, %v1158_v22  ;;  %v1095_v13 = vadd.f32 %v1075_v8, %v1031_v25  ;;  %v949_v2 = vmul.f32 %v1115_v50, %v2849_v45 }
  0x6d   : > { %v968_v31 = vadd.f32 %v948_v10, %v904_v26  ;;  %v841_v36 = vadd.f32 %v821_v12, %v776_v27  ;;  %v1013_v48 = vmul.f32 %v2852_v46, %v989_v47  ;;  %v1077_v49 = vmul.f32 %v2858_v52, %v1053_v29 }
  0x6e   : > { %v713_v51 = vadd.f32 %v693_v17, %v649_v6  ;;  %v822_v19 = vmul.f32 %v988_v54, %v2843_v43  ;;  %v1159_v53 = vadd.f32 %v1139_v59, %v1095_v13  ;;  %v650_v38 = vmul.f32 %v987_v42, %v2834_v39 }
  0x6f   : > { %v1032_v37 = vadd.f32 %v1012_v16, %v968_v31  ;;  %v905_v56 = vadd.f32 %v885_v3, %v841_v36  ;;  %v886_v55 = vmul.f32 %v1052_v18, %v2846_v44  ;;  %v694_v58 = vmul.f32 %v1051_v4, %v2837_v40  ;;  %v1055_v36 = vld [vmem:[#allocation2 + $0xb1] sm:$0xff] }
  0x70   : > { %v777_v24 = vadd.f32 %v757_v23, %v713_v51  ;;  %v758_v61 = vmul.f32 %v1115_v50, %v2840_v41  ;;  %2446 = vmatmul.mubr.msk.f32.gmra.mrb[6].mxu0 %vm553_vm1, %v1159_v53  ;;  %v1141_v63 = vmul.f32 %v2862_v60, %v1117_v57  ;;  %v950_v1 = vmul.f32 %v1116_v11, %v2849_v45  ;;  %v1054_v50 = vld [vmem:[#allocation2 + $0xa9] sm:$0xff] }
  0x71   : > { %v1096_v20 = vadd.f32 %v1076_v28, %v1032_v37  ;;  %v969_v62 = vadd.f32 %v949_v2, %v905_v56  ;;  %v1014_v42 = vmul.f32 %v2852_v46, %v990_v5  ;;  %v714_v8 = vadd.f32 %v694_v58, %v650_v38  ;;  %v1119_v38 = vld [vmem:[#allocation2 + $0xb2] sm:$0xff] }
  0x72   : > { %v842_v7 = vadd.f32 %v822_v19, %v777_v24  ;;  %v823_v10 = vmul.f32 %v989_v47, %v2843_v43  ;;  %v887_v4 = vmul.f32 %v1053_v29, %v2846_v44  ;;  %v651_v14 = vmul.f32 %v988_v54, %v2834_v39  ;;  %v991_v54 = vld [vmem:[#allocation2 + $0xb0] sm:$0xff]  ;;  %v2992_v24 = vld [vmem:[#allocation2 + $0xc0] sm:$0xff] }
  0x73   : > { %v1160_v32 = vadd.f32 %v1140_v30, %v1096_v20  ;;  %v1033_v12 = vadd.f32 %v1013_v48, %v969_v62  ;;  %v778_v21 = vadd.f32 %v758_v61, %v714_v8  ;;  %v695_v59 = vmul.f32 %v1052_v18, %v2837_v40 }
  0x74   : > { %v906_v15 = vadd.f32 %v886_v55, %v842_v7  ;;  %v759_v16 = vmul.f32 %v1116_v11, %v2840_v41  ;;  %v1078_v6 = vmul.f32 %v2858_v52, %v1054_v50  ;;  %v1142_v22 = vmul.f32 %v2862_v60, %v1118_v9  ;;  %v3001_v7 = vld [vmem:[#allocation2 + $0xc2] sm:$0xff] }
  0x75   : > { %2448 = vmatprep.mubr.msk.f32.mxu0 %vm553_vm1, %v1160_v32  ;;  %v1097_v3 = vadd.f32 %v1077_v49, %v1033_v12  ;;  %v951_v25 = vmul.f32 %v1117_v57, %v2849_v45  ;;  %v843_v27 = vadd.f32 %v823_v10, %v778_v21  ;;  %v715_v28 = vadd.f32 %v695_v59, %v651_v14  ;;  %v3011_v21 = vld [vmem:[#allocation2 + $0xc8] sm:$0xff] }
  0x76   : > { %v970_v26 = vadd.f32 %v950_v1, %v906_v15  ;;  %v824_v30 = vmul.f32 %v990_v5, %v2843_v43  ;;  %v1015_v18 = vmul.f32 %v2852_v46, %v991_v54  ;;  %v888_v11 = vmul.f32 %v1054_v50, %v2846_v44  ;;  %v2999_v1 = vld [vmem:[#allocation2 + $0xc1] sm:$0xff]  ;;  %v3013_v59 = vld [vmem:[#allocation2 + $0xc9] sm:$0xff] }
  0x77   : > { %v1161_v17 = vadd.f32 %v1141_v63, %v1097_v3  ;;  %v652_v23 = vmul.f32 %v989_v47, %v2834_v39  ;;  %v907_v31 = vadd.f32 %v887_v4, %v843_v27  ;;  %v779_v2 = vadd.f32 %v759_v16, %v715_v28  ;;  %v3022_v27 = vld [vmem:[#allocation2 + $0xca] sm:$0xff] }
  0x78   : > { %v1034_v13 = vadd.f32 %v1014_v42, %v970_v26  ;;  %v696_v48 = vmul.f32 %v1053_v29, %v2837_v40  ;;  %v1079_v49 = vmul.f32 %v2858_v52, %v1055_v36  ;;  %v952_v51 = vmul.f32 %v1118_v9, %v2849_v45 }
  0x79   : > { %2449 = vmatmul.mubr.msk.f32.gmra.mrb[8].mxu0 %vm553_vm1, %v1161_v17  ;;  %v760_v19 = vmul.f32 %v1117_v57, %v2840_v41  ;;  %v825_v53 = vmul.f32 %v991_v54, %v2843_v43  ;;  %v971_v56 = vadd.f32 %v951_v25, %v907_v31  ;;  %v844_v47 = vadd.f32 %v824_v30, %v779_v2  ;;  %v994_v17 = vld [vmem:[#allocation2 + $0xd8] sm:$0xff] }
  0x7a   : > { %v1098_v37 = vadd.f32 %v1078_v6, %v1034_v13  ;;  %v716_v55 = vadd.f32 %v696_v48, %v652_v23  ;;  %v1143_v58 = vmul.f32 %v2862_v60, %v1119_v38  ;;  %v1016_v29 = vmul.f32 %v2852_v46, %v2992_v24  ;;  %v1058_v2 = vld [vmem:[#allocation2 + $0xd9] sm:$0xff] }
  0x7b   : > { %v889_v61 = vmul.f32 %v1055_v36, %v2846_v44  ;;  %v653_v20 = vmul.f32 %v990_v5, %v2834_v39  ;;  %v1035_v57 = vadd.f32 %v1015_v18, %v971_v56  ;;  %v908_v63 = vadd.f32 %v888_v11, %v844_v47  ;;  %v3033_v48 = vld [vmem:[#allocation2 + $0xda] sm:$0xff]  ;;  %v806_v47 = vld [vmem:[#allocation2 + $0xf0] sm:$0xff] }
  0x7c   : > { %v1162_v62 = vadd.f32 %v1142_v22, %v1098_v37  ;;  %v780_v42 = vadd.f32 %v760_v19, %v716_v55  ;;  %v1080_v8 = vmul.f32 %v2858_v52, %v2999_v1  ;;  %v1144_v10 = vmul.f32 %v2862_v60, %v3001_v7 }
  0x7d   : > { %v697_v32 = vmul.f32 %v1054_v50, %v2837_v40  ;;  %v761_v12 = vmul.f32 %v1118_v9, %v2840_v41  ;;  %v1099_v5 = vadd.f32 %v1079_v49, %v1035_v57  ;;  %v972_v4 = vadd.f32 %v952_v51, %v908_v63 }
  0x7e   : > { %2451 = vmatprep.mubr.msk.f32.mxu0 %vm553_vm1, %v1162_v62  ;;  %v845_v14 = vadd.f32 %v825_v53, %v780_v42  ;;  %v953_v15 = vmul.f32 %v1119_v38, %v2849_v45  ;;  %v1017_v16 = vmul.f32 %v2852_v46, %v3011_v21  ;;  %v1081_v3 = vmul.f32 %v2858_v52, %v3013_v59 }
  0x7f   : > { %v717_v50 = vadd.f32 %v697_v32, %v653_v20  ;;  %v826_v9 = vmul.f32 %v2992_v24, %v2843_v43  ;;  %v1163_v6 = vadd.f32 %v1143_v58, %v1099_v5  ;;  %v1036_v22 = vadd.f32 %v1016_v29, %v972_v4  ;;  %v3044_v20 = vld [vmem:[#allocation2 + $0xf1] sm:$0xff]  ;;  %v3052_v32 = vld [vmem:[#allocation2 + $0xe0] sm:$0xff] }
  0x80   : > { %v909_v25 = vadd.f32 %v889_v61, %v845_v14  ;;  %v654_v26 = vmul.f32 %v991_v54, %v2834_v39  ;;  %v890_v30 = vmul.f32 %v2999_v1, %v2846_v44  ;;  %v698_v18 = vmul.f32 %v1055_v36, %v2837_v40  ;;  %v3055_v4 = vld [vmem:[#allocation2 + $0xf2] sm:$0xff] }
  0x81   : > { %v781_v28 = vadd.f32 %v761_v12, %v717_v50  ;;  %v762_v11 = vmul.f32 %v1119_v38, %v2840_v41  ;;  %2452 = vmatmul.mubr.msk.f32.gmra.mrb[10].mxu0 %vm553_vm1, %v1163_v6  ;;  %v1100_v23 = vadd.f32 %v1080_v8, %v1036_v22  ;;  %v1145_v31 = vmul.f32 %v2862_v60, %v3022_v27  ;;  %v3063_v6 = vld [vmem:[#allocation2 + $0xe1] sm:$0xff] }
  0x82   : > { %v973_v13 = vadd.f32 %v953_v15, %v909_v25  ;;  %v954_v54 = vmul.f32 %v3001_v7, %v2849_v45  ;;  %v1018_v51 = vmul.f32 %v2852_v46, %v994_v17  ;;  %v718_v19 = vadd.f32 %v698_v18, %v654_v26  ;;  %v998_v25 = vld [vmem:[#allocation2 + $0x108] sm:$0xff] }
  0x83   : > { %v846_v49 = vadd.f32 %v826_v9, %v781_v28  ;;  %v827_v36 = vmul.f32 %v3011_v21, %v2843_v43  ;;  %v1164_v53 = vadd.f32 %v1144_v10, %v1100_v23  ;;  %v891_v56 = vmul.f32 %v3013_v59, %v2846_v44 }
  0x84   : > { %v1037_v37 = vadd.f32 %v1017_v16, %v973_v13  ;;  %v657_v38 = vmul.f32 %v994_v17, %v2834_v39  ;;  %v782_v58 = vadd.f32 %v762_v11, %v718_v19  ;;  %v701_v29 = vmul.f32 %v1058_v2, %v2837_v40  ;;  %v1123_v13 = vld [vmem:[#allocation2 + $0xe2] sm:$0xff] }
  0x85   : > { %v910_v55 = vadd.f32 %v890_v30, %v846_v49  ;;  %v765_v61 = vmul.f32 %v3033_v48, %v2840_v41  ;;  %2454 = vmatprep.mubr.msk.f32.mxu0 %vm553_vm1, %v1164_v53  ;;  %v1082_v57 = vmul.f32 %v2858_v52, %v1058_v2  ;;  %v1146_v63 = vmul.f32 %v2862_v60, %v3033_v48 }
  0x86   : > { %v1101_v62 = vadd.f32 %v1081_v3, %v1037_v37  ;;  %v955_v42 = vmul.f32 %v3022_v27, %v2849_v45  ;;  %v847_v10 = vadd.f32 %v827_v36, %v782_v58  ;;  %v721_v12 = vadd.f32 %v701_v29, %v657_v38  ;;  %v807_v38 = vld [vmem:[#allocation2 + $0xf8] sm:$0xff] }
  0x87   : > { %v974_v8 = vadd.f32 %v954_v54, %v910_v55  ;;  %v830_v5 = vmul.f32 %v2843_v43, %v806_v47  ;;  %v1019_v15 = vmul.f32 %v2852_v46, %v3052_v32  ;;  %v894_v16 = vmul.f32 %v2846_v44, %v3044_v20  ;;  %v1062_v54 = vld [vmem:[#allocation2 + $0x109] sm:$0xff] }
  0x88   : > { %v1165_v14 = vadd.f32 %v1145_v31, %v1101_v62  ;;  %v655_v3 = vmul.f32 %v2992_v24, %v2834_v39  ;;  %v911_v9 = vadd.f32 %v891_v56, %v847_v10  ;;  %v785_v22 = vadd.f32 %v765_v61, %v721_v12  ;;  %v1126_v56 = vld [vmem:[#allocation2 + $0x10a] sm:$0xff] }
  0x89   : > { %v1038_v50 = vadd.f32 %v1018_v51, %v974_v8  ;;  %v699_v26 = vmul.f32 %v2999_v1, %v2837_v40  ;;  %v1083_v28 = vmul.f32 %v2858_v52, %v3063_v6  ;;  %v958_v30 = vmul.f32 %v2849_v45, %v3055_v4 }
  0x8a   : > { %2455 = vmatmul.mubr.msk.f32.gmra.mrb[12].mxu0 %vm553_vm1, %v1165_v14  ;;  %v763_v24 = vmul.f32 %v3001_v7, %v2840_v41  ;;  %v828_v18 = vmul.f32 %v994_v17, %v2843_v43  ;;  %v975_v23 = vadd.f32 %v955_v42, %v911_v9  ;;  %v850_v31 = vadd.f32 %v830_v5, %v785_v22 }
  0x8b   : > { %v1102_v11 = vadd.f32 %v1082_v57, %v1038_v50  ;;  %v719_v49 = vadd.f32 %v699_v26, %v655_v3  ;;  %v1147_v1 = vmul.f32 %v2862_v60, %v1123_v13  ;;  %v1022_v51 = vmul.f32 %v2852_v46, %v998_v25 }
  0x8c   : > { %v892_v19 = vmul.f32 %v1058_v2, %v2846_v44  ;;  %v658_v36 = vmul.f32 %v3052_v32, %v2834_v39  ;;  %v1039_v37 = vadd.f32 %v1019_v15, %v975_v23  ;;  %v914_v7 = vadd.f32 %v894_v16, %v850_v31  ;;  %v935_v16 = vld [vmem:[#allocation2 + $0xfa] sm:$0xff] }
  0x8d   : > { %v1166_v53 = vadd.f32 %v1146_v63, %v1102_v11  ;;  %v783_v17 = vadd.f32 %v763_v24, %v719_v49  ;;  %v1086_v55 = vmul.f32 %v2858_v52, %v1062_v54  ;;  %v702_v58 = vmul.f32 %v3063_v6, %v2837_v40  ;;  %v871_v63 = vld [vmem:[#allocation2 + $0xf9] sm:$0xff] }
  0x8e   : > { %v766_v29 = vmul.f32 %v1123_v13, %v2840_v41  ;;  %v1103_v61 = vadd.f32 %v1083_v28, %v1039_v37  ;;  %v978_v2 = vadd.f32 %v958_v30, %v914_v7  ;;  %v956_v57 = vmul.f32 %v3033_v48, %v2849_v45  ;;  %v999_v28 = vld [vmem:[#allocation2 + $0x110] sm:$0xff] }
  0x8f   : > { %2457 = vmatprep.mubr.msk.f32.mxu0 %vm553_vm1, %v1166_v53  ;;  %v848_v62 = vadd.f32 %v828_v18, %v783_v17  ;;  %v1150_v42 = vmul.f32 %v2862_v60, %v1126_v56  ;;  %v1020_v8 = vmul.f32 %v2852_v46, %v806_v47  ;;  %v722_v10 = vadd.f32 %v702_v58, %v658_v36  ;;  %v1127_v54 = vld [vmem:[#allocation2 + $0x112] sm:$0xff] }
  0x90   : > { %v831_v12 = vmul.f32 %v2843_v43, %v807_v38  ;;  %v1167_v5 = vadd.f32 %v1147_v1, %v1103_v61  ;;  %v1042_v14 = vadd.f32 %v1022_v51, %v978_v2  ;;  %v656_v3 = vmul.f32 %v3011_v21, %v2834_v39 }
  0x91   : > { %v912_v15 = vadd.f32 %v892_v19, %v848_v62  ;;  %v786_v50 = vadd.f32 %v766_v29, %v722_v10  ;;  %v895_v9 = vmul.f32 %v2846_v44, %v871_v63  ;;  %v700_v48 = vmul.f32 %v3013_v59, %v2837_v40  ;;  %v1063_v59 = vld [vmem:[#allocation2 + $0x111] sm:$0xff] }
  0x92   : > { %v764_v22 = vmul.f32 %v3022_v27, %v2840_v41  ;;  %2458 = vmatmul.mubr.msk.f32.gmra.mrb[14].mxu0 %vm553_vm1, %v1167_v5  ;;  %v1106_v47 = vadd.f32 %v1086_v55, %v1042_v14  ;;  %v1084_v26 = vmul.f32 %v2858_v52, %v3044_v20  ;;  %v959_v39 = vmul.f32 %v2849_v45, %v935_v16 }
  0x93   : > { %v976_v25 = vadd.f32 %v956_v57, %v912_v15  ;;  %v851_v30 = vadd.f32 %v831_v12, %v786_v50  ;;  %v720_v21 = vadd.f32 %v700_v48, %v656_v3  ;;  %v829_v24 = vmul.f32 %v3052_v32, %v2843_v43 }
  0x94   : > { %v1170_v18 = vadd.f32 %v1150_v42, %v1106_v47  ;;  %v1148_v41 = vmul.f32 %v2862_v60, %v3055_v4  ;;  %v1023_v11 = vmul.f32 %v2852_v46, %v999_v28  ;;  %v893_v20 = vmul.f32 %v3063_v6, %v2846_v44 }
  0x95   : > { %v1040_v40 = vadd.f32 %v1020_v8, %v976_v25  ;;  %v915_v27 = vadd.f32 %v895_v9, %v851_v30  ;;  %v784_v23 = vadd.f32 %v764_v22, %v720_v21  ;;  %v1087_v43 = vmul.f32 %v2858_v52, %v1063_v59 }
  0x96   : > { %2463 = vmatprep.mubr.msk.f32.mxu1 %vm553_vm1, %v1170_v18  ;;  %v957_v1 = vmul.f32 %v1123_v13, %v2849_v45  ;;  %v1151_v19 = vmul.f32 %v2862_v60, %v1127_v54  ;;  %v1021_v53 = vmul.f32 %v2852_v46, %v807_v38  ;;  %v1085_v37 = vmul.f32 %v2858_v52, %v871_v63  ;;  %v3161_v46 = vld [vmem:[%s3470_s5] ss:$0 sm:$0xff] }
  0x97   : > { %v1104_v31 = vadd.f32 %v1084_v26, %v1040_v40  ;;  %v979_v49 = vadd.f32 %v959_v39, %v915_v27  ;;  %v849_v32 = vadd.f32 %v829_v24, %v784_v23  ;;  %v1149_v17 = vmul.f32 %v2862_v60, %v935_v16 }
  0x99   : > { %v1168_v51 = vadd.f32 %v1148_v41, %v1104_v31  ;;  %v1043_v4 = vadd.f32 %v1023_v11, %v979_v49  ;;  %v913_v36 = vadd.f32 %v893_v20, %v849_v32 }
  0x9b   : > { %2460 = vmatprep.mubr.msk.f32.mxu0 %vm553_vm1, %v1168_v51  ;;  %v1107_v44 = vadd.f32 %v1087_v43, %v1043_v4  ;;  %v977_v6 = vadd.f32 %v957_v1, %v913_v36 }
  0x9d   : > { %v1171_v7 = vadd.f32 %v1151_v19, %v1107_v44  ;;  %v1041_v56 = vadd.f32 %v1021_v53, %v977_v6 }
  0x9f   : > { %2464 = vmatmul.mubr.msk.f32.vlgmr.msra.gmra.mrb[0].mxu1 %vm553_vm1, %v1171_v7  ;;  %v1105_v45 = vadd.f32 %v1085_v37, %v1041_v56 }
  0xa1   : > { %v1169_v13 = vadd.f32 %v1149_v17, %v1105_v45 }
  0xa3   : > { %2461 = vmatmul.mubr.msk.f32.gmra.mrb[16].mxu0 %vm553_vm1, %v1169_v13 }
 0x12b   : > { %v2438_v52 = vpop.f32.mrb[0].mxu0 }
 0x12c   : > { %v1316_v60 = vadd.f32 %v2438_v52, %v3161_v46  ;;  %v1310_v38 = vpop.f32.mrb[1].mxu0  ;;  %v2582_v52 = vmov (!%p2344_p12), 0.0  }
 0x12d   : > { %v1311_v55 = vadd.f32 %v3161_v46, %v1310_v38 }
 0x12e   : > { %v1410_v58 = vmax.f32 %v1316_v60, 0.0 }
 0x12f   : > { %v1409_v29 = vmax.f32 %v1311_v55, 0.0 }
 0x130   : > { %1452 = vst.msk [vmem:[#allocation3 + $0x9] sm:$0xff] %vm1450_vm4, %v1410_v58 }
 0x131   : > { %1451 = vst.msk [vmem:[#allocation3 + $0x1] sm:$0xff] %vm1450_vm4, %v1409_v29  ;;  %1475 = vst.msk [vmem:[#allocation3 + $0x9] sm:$0xff] (!%p2344_p12), %vm1450_vm4, %v2582_v52 }
 0x132   : > { %v2441_v61 = vpop.f32.mrb[2].mxu0  ;;  %1474 = vst.msk [vmem:[#allocation3 + $0x1] sm:$0xff] (!%p2344_p12), %vm1450_vm4, %v2582_v52 }
 0x133   : > { %v1326_v0 = vadd.f32 %v2441_v61, %v3161_v46  ;;  %v1320_v2 = vpop.f32.mrb[3].mxu0 }
 0x134   : > { %v1321_v62 = vadd.f32 %v3161_v46, %v1320_v2 }
 0x135   : > { %v1412_v57 = vmax.f32 %v1326_v0, 0.0 }
 0x136   : > { %v1411_v63 = vmax.f32 %v1321_v62, 0.0 }
 0x137   : > { %1454 = vst.msk [vmem:[#allocation3 + $0x21] sm:$0xff] %vm1450_vm4, %v1412_v57 }
 0x138   : > { %1453 = vst.msk [vmem:[#allocation3 + $0x19] sm:$0xff] %vm1450_vm4, %v1411_v63 }
 0x13b   : > { %v2444_v42 = vpop.f32.mrb[4].mxu0 }
 0x13c   : > { %v1336_v8 = vadd.f32 %v2444_v42, %v3161_v46  ;;  %v1330_v10 = vpop.f32.mrb[5].mxu0 }
 0x13d   : > { %v1331_v12 = vadd.f32 %v3161_v46, %v1330_v10 }
 0x13e   : > { %v1414_v5 = vmax.f32 %v1336_v8, 0.0 }
 0x13f   : > { %v1413_v14 = vmax.f32 %v1331_v12, 0.0 }
 0x140   : > { %1456 = vst.msk [vmem:[#allocation3 + $0x39] sm:$0xff] %vm1450_vm4, %v1414_v5 }
 0x141   : > { %1455 = vst.msk [vmem:[#allocation3 + $0x31] sm:$0xff] %vm1450_vm4, %v1413_v14 }
 0x143   : > { %v2447_v15 = vpop.f32.mrb[6].mxu0 }
 0x144   : > { %v1346_v16 = vadd.f32 %v2447_v15, %v3161_v46  ;;  %v1340_v3 = vpop.f32.mrb[7].mxu0 }
 0x145   : > { %v1341_v50 = vadd.f32 %v3161_v46, %v1340_v3 }
 0x146   : > { %v1416_v9 = vmax.f32 %v1346_v16, 0.0 }
 0x147   : > { %v1415_v48 = vmax.f32 %v1341_v50, 0.0 }
 0x148   : > { %1458 = vst.msk [vmem:[#allocation3 + $0x51] sm:$0xff] %vm1450_vm4, %v1416_v9 }
 0x149   : > { %1457 = vst.msk [vmem:[#allocation3 + $0x49] sm:$0xff] %vm1450_vm4, %v1415_v48 }
 0x14c   : > { %v2450_v22 = vpop.f32.mrb[8].mxu0 }
 0x14d   : > { %v1356_v47 = vadd.f32 %v2450_v22, %v3161_v46  ;;  %v1350_v25 = vpop.f32.mrb[9].mxu0 }
 0x14e   : > { %v1351_v26 = vadd.f32 %v3161_v46, %v1350_v25 }
 0x14f   : > { %v1418_v28 = vmax.f32 %v1356_v47, 0.0 }
 0x150   : > { %v1417_v30 = vmax.f32 %v1351_v26, 0.0 }
 0x151   : > { %1460 = vst.msk [vmem:[#allocation3 + $0x69] sm:$0xff] %vm1450_vm4, %v1418_v28 }
 0x152   : > { %1459 = vst.msk [vmem:[#allocation3 + $0x61] sm:$0xff] %vm1450_vm4, %v1417_v30 }
 0x154   : > { %v2453_v39 = vpop.f32.mrb[10].mxu0 }
 0x155   : > { %v1366_v21 = vadd.f32 %v2453_v39, %v3161_v46  ;;  %v1360_v24 = vpop.f32.mrb[11].mxu0 }
 0x156   : > { %v1361_v18 = vadd.f32 %v3161_v46, %v1360_v24 }
 0x157   : > { %v1420_v40 = vmax.f32 %v1366_v21, 0.0 }
 0x158   : > { %v1419_v41 = vmax.f32 %v1361_v18, 0.0 }
 0x159   : > { %1462 = vst.msk [vmem:[#allocation3 + $0x81] sm:$0xff] %vm1450_vm4, %v1420_v40 }
 0x15a   : > { %1461 = vst.msk [vmem:[#allocation3 + $0x79] sm:$0xff] %vm1450_vm4, %v1419_v41 }
 0x15d   : > { %v2456_v59 = vpop.f32.mrb[12].mxu0 }
 0x15e   : > { %v1376_v27 = vadd.f32 %v2456_v59, %v3161_v46  ;;  %v1370_v11 = vpop.f32.mrb[13].mxu0 }
 0x15f   : > { %v1371_v23 = vadd.f32 %v3161_v46, %v1370_v11 }
 0x160   : > { %v1422_v20 = vmax.f32 %v1376_v27, 0.0 }
 0x161   : > { %v1421_v31 = vmax.f32 %v1371_v23, 0.0 }
 0x162   : > { %1464 = vst.msk [vmem:[#allocation3 + $0x99] sm:$0xff] %vm1450_vm4, %v1422_v20 }
 0x163   : > { %1463 = vst.msk [vmem:[#allocation3 + $0x91] sm:$0xff] %vm1450_vm4, %v1421_v31 }
 0x165   : > { %v2459_v54 = vpop.f32.mrb[14].mxu0 }
 0x166   : > { %v1386_v49 = vadd.f32 %v2459_v54, %v3161_v46  ;;  %v1380_v43 = vpop.f32.mrb[15].mxu0 }
 0x167   : > { %v1381_v32 = vadd.f32 %v3161_v46, %v1380_v43 }
 0x168   : > { %v1424_v1 = vmax.f32 %v1386_v49, 0.0 }
 0x169   : > { %v1423_v51 = vmax.f32 %v1381_v32, 0.0 }
 0x16a   : > { %1466 = vst.msk [vmem:[#allocation3 + $0xb1] sm:$0xff] %vm1450_vm4, %v1424_v1 }
 0x16b   : > { %1465 = vst.msk [vmem:[#allocation3 + $0xa9] sm:$0xff] %vm1450_vm4, %v1423_v51 }
 0x172   : > { %v2465_v4 = vpop.f32.mrb[0].mxu1 }
 0x173   : > { %v1406_v19 = vadd.f32 %v2465_v4, %v3161_v46  ;;  %v1400_v36 = vpop.f32.mrb[1].mxu1 }
 0x174   : > { %v1401_v53 = vadd.f32 %v3161_v46, %v1400_v36 }
 0x175   : > { %v1428_v44 = vmax.f32 %v1406_v19, 0.0 }
 0x176   : > { %v2462_v6 = vpop.f32.mrb[16].mxu0  ;;  %v1427_v37 = vmax.f32 %v1401_v53, 0.0  ;;  %1473 = sbr.rel (%p2344_p12) target bundleno = 381 (0x17d), region = 76 }
 0x177   : > { %1470 = vst.msk [vmem:[#allocation3 + $0xe1] sm:$0xff] %vm1450_vm4, %v1428_v44  ;;  %v1396_v7 = vadd.f32 %v2462_v6, %v3161_v46  ;;  %v1390_v56 = vpop.f32.mrb[17].mxu0 }
 0x178   : > { %1469 = vst.msk [vmem:[#allocation3 + $0xd9] sm:$0xff] %vm1450_vm4, %v1427_v37  ;;  %v1391_v17 = vadd.f32 %v3161_v46, %v1390_v56 }
 0x179   : > { %v1426_v45 = vmax.f32 %v1396_v7, 0.0 }
 0x17a   : > { %v1425_v13 = vmax.f32 %v1391_v17, 0.0 }
 0x17b   : > { %1468 = vst.msk [vmem:[#allocation3 + $0xc9] sm:$0xff] %vm1450_vm4, %v1426_v45 }
 0x17c   : > { %1467 = vst.msk [vmem:[#allocation3 + $0xc1] sm:$0xff] %vm1450_vm4, %v1425_v13 }
 0x17d PF: > { %1478 = sbr.rel (%p2346_p0) target bundleno = 388 (0x184), region = 80  ;;  %v2583_v60 = vmov (!%p2346_p0), 0.0  }
 0x17e   : > { %1480 = vst.msk [vmem:[#allocation3 + $0xd9] sm:$0xff] (!%p2346_p0), %vm1450_vm4, %v2583_v60  ;;  %1481 = vst.msk [vmem:[#allocation3 + $0xe1] sm:$0xff] (!%p2346_p0), %vm1450_vm4, %v2583_v60 }
 0x184 PF: > { %v1939_v46 = vld [vmem:[%s3472_s7] sm:$0xff]  ;;  %v1484_v58 = vld [vmem:[%s3471_s6 + $0x8] sm:$0x7]  ;;  %v1626_v42 = vld [vmem:[#allocation3 + $0x18] sm:$0xff] }
 0x185   : > { %v1482_v38 = vld [vmem:[%s3471_s6] sm:$0x7]  ;;  %v1483_v55 = vld [vmem:[%s3471_s6 + $0x4] sm:$0x7]  ;;  %2466 = vmatprep.subr.mxu1 %v1939_v46  ;;  %v3245_v15 = vrot.slane %v1484_v58, %v2827_v33  ;;  %v3249_v50 = vrot.slane %v1484_v58, %v2829_v34  ;;  %v1486_v9 = vld [vmem:[#allocation3 + $0x8] sm:$0xff]  ;;  %v3252_v25 = vrot.slane %v1484_v58, %v2831_v35 }
 0x186   : > { %v1485_v29 = vld [vmem:[#allocation3] sm:$0xff]  ;;  %v3224_v61 = vrot.slane %v1482_v38, %v2827_v33  ;;  %v3227_v2 = vrot.slane %v1482_v38, %v2829_v34  ;;  %v3230_v62 = vrot.slane %v1482_v38, %v2831_v35  ;;  %v3233_v57 = vrot.slane %v1483_v55, %v2827_v33  ;;  %2467 = vmatpush3.msra.mxu1 %v1939_v46  ;;  %v1522_v48 = vld [vmem:[#allocation3 + $0x9] sm:$0xff]  ;;  %v1887_v59 = vld [vmem:[#allocation3 + $0x32] sm:$0xff] }
 0x187   : > { %v1521_v0 = vld [vmem:[#allocation3 + $0x1] sm:$0xff]  ;;  %v3236_v8 = vrot.slane %v1483_v55, %v2829_v34  ;;  %v3239_v10 = vrot.slane %v1483_v55, %v2831_v35  ;;  %v1678_v3 = vld [vmem:[#allocation3 + $0x19] sm:$0xff]  ;;  %v1574_v30 = vld [vmem:[#allocation3 + $0xa] sm:$0xff]  ;;  %v1907_v31 = vmul.f32 %v3252_v25, %v1887_v59 }
 0x188   : > { %v1573_v63 = vld [vmem:[#allocation3 + $0x2] sm:$0xff]  ;;  %v1505_v12 = vmul.f32 %v3224_v61, %v1485_v29  ;;  %v1541_v5 = vmul.f32 %v3227_v2, %v1521_v0  ;;  %v1646_v16 = vmul.f32 %v3233_v57, %v1626_v42  ;;  %v1730_v47 = vld [vmem:[#allocation3 + $0x1a] sm:$0xff]  ;;  %v1506_v26 = vmul.f32 %v3224_v61, %v1486_v9  ;;  %v1783_v24 = vld [vmem:[#allocation3 + $0x30] sm:$0xff] }
 0x189   : > { %v1593_v14 = vmul.f32 %v3230_v62, %v1573_v63  ;;  %v1542_v28 = vmul.f32 %v3227_v2, %v1522_v48  ;;  %v1627_v33 = vld [vmem:[#allocation3 + $0x20] sm:$0xff]  ;;  %v1698_v39 = vmul.f32 %v3236_v8, %v1678_v3  ;;  %v1750_v21 = vmul.f32 %v3239_v10, %v1730_v47  ;;  %v1835_v35 = vld [vmem:[#allocation3 + $0x31] sm:$0xff]  ;;  %v3273_v60 = vld [vmem:[#allocation3 + $0x48] sm:$0xff] }
 0x18a   : > { %v1557_v22 = vadd.f32 %v1541_v5, %v1505_v12  ;;  %v1594_v34 = vmul.f32 %v3230_v62, %v1574_v30  ;;  %v1507_v18 = vmul.f32 %v1626_v42, %v3224_v61  ;;  %v1803_v41 = vmul.f32 %v3245_v15, %v1783_v24  ;;  %v1679_v23 = vld [vmem:[#allocation3 + $0x21] sm:$0xff]  ;;  %v1784_v4 = vld [vmem:[#allocation3 + $0x38] sm:$0xff]  ;;  %v1837_v42 = vld [vmem:[#allocation3 + $0x49] sm:$0xff] }
 0x18b   : > { %v1558_v27 = vadd.f32 %v1542_v28, %v1506_v26  ;;  %v1647_v11 = vmul.f32 %v3233_v57, %v1627_v33  ;;  %v1855_v20 = vmul.f32 %v3249_v50, %v1835_v35  ;;  %v1699_v54 = vmul.f32 %v3236_v8, %v1679_v23  ;;  %v1731_v49 = vld [vmem:[#allocation3 + $0x22] sm:$0xff]  ;;  %v1836_v19 = vld [vmem:[#allocation3 + $0x39] sm:$0xff] }
 0x18c   : > { %v1609_v40 = vadd.f32 %v1593_v14, %v1557_v22  ;;  %v1543_v43 = vmul.f32 %v1678_v3, %v3227_v2  ;;  %v1751_v51 = vmul.f32 %v3239_v10, %v1731_v49  ;;  %v1595_v36 = vmul.f32 %v1730_v47, %v3230_v62  ;;  %v1888_v6 = vld [vmem:[#allocation3 + $0x3a] sm:$0xff]  ;;  %v1889_v14 = vld [vmem:[#allocation3 + $0x4a] sm:$0xff] }
 0x18d   : > { %v1610_v1 = vadd.f32 %v1594_v34, %v1558_v27  ;;  %v1804_v53 = vmul.f32 %v3245_v15, %v1784_v4  ;;  %v1856_v44 = vmul.f32 %v3249_v50, %v1836_v19  ;;  %v1648_v7 = vmul.f32 %v1783_v24, %v3233_v57 }
 0x18e   : > { %v1662_v32 = vadd.f32 %v1646_v16, %v1609_v40  ;;  %v1559_v37 = vadd.f32 %v1543_v43, %v1507_v18  ;;  %v1908_v45 = vmul.f32 %v3252_v25, %v1888_v6  ;;  %v1700_v13 = vmul.f32 %v1835_v35, %v3236_v8 }
 0x18f   : > { %v1663_v17 = vadd.f32 %v1647_v11, %v1610_v1  ;;  %v1508_v46 = vmul.f32 %v1627_v33, %v3224_v61  ;;  %v1544_v38 = vmul.f32 %v1679_v23, %v3227_v2  ;;  %v1596_v55 = vmul.f32 %v1731_v49, %v3230_v62  ;;  %v1838_v11 = vld [vmem:[#allocation3 + $0x51] sm:$0xff] }
 0x190   : > { %v1714_v56 = vadd.f32 %v1698_v39, %v1662_v32  ;;  %v1611_v52 = vadd.f32 %v1595_v36, %v1559_v37  ;;  %v1752_v0 = vmul.f32 %v1887_v59, %v3239_v10  ;;  %v1805_v63 = vmul.f32 %v3245_v15, %v3273_v60 }
 0x191   : > { %v1715_v29 = vadd.f32 %v1699_v54, %v1663_v17  ;;  %v1857_v5 = vmul.f32 %v3249_v50, %v1837_v42  ;;  %v1560_v16 = vadd.f32 %v1544_v38, %v1508_v46  ;;  %v1649_v3 = vmul.f32 %v1784_v4, %v3233_v57 }
 0x192   : > { %v1766_v58 = vadd.f32 %v1750_v21, %v1714_v56  ;;  %v1664_v12 = vadd.f32 %v1648_v7, %v1611_v52  ;;  %v1909_v22 = vmul.f32 %v3252_v25, %v1889_v14  ;;  %v1701_v47 = vmul.f32 %v1836_v19, %v3236_v8  ;;  %v1890_v7 = vld [vmem:[#allocation3 + $0x52] sm:$0xff]  ;;  %v1787_v52 = vld [vmem:[#allocation3 + $0x60] sm:$0xff] }
 0x193   : > { %v1767_v48 = vadd.f32 %v1751_v51, %v1715_v29  ;;  %v1612_v28 = vadd.f32 %v1596_v55, %v1560_v16  ;;  %v1509_v30 = vmul.f32 %v1783_v24, %v3224_v61  ;;  %v1545_v33 = vmul.f32 %v1835_v35, %v3227_v2  ;;  %v1891_v16 = vld [vmem:[#allocation3 + $0x62] sm:$0xff] }
 0x194   : > { %v1819_v9 = vadd.f32 %v1803_v41, %v1766_v58  ;;  %v1716_v26 = vadd.f32 %v1700_v13, %v1664_v12  ;;  %v1753_v34 = vmul.f32 %v1888_v6, %v3239_v10  ;;  %v1597_v18 = vmul.f32 %v1887_v59, %v3230_v62  ;;  %v1786_v41 = vld [vmem:[#allocation3 + $0x50] sm:$0xff] }
 0x195   : > { %v1820_v21 = vadd.f32 %v1804_v53, %v1767_v48  ;;  %v1665_v27 = vadd.f32 %v1649_v3, %v1612_v28  ;;  %v1561_v23 = vadd.f32 %v1545_v33, %v1509_v30  ;;  %v1650_v54 = vmul.f32 %v3273_v60, %v3233_v57  ;;  %v1788_v30 = vld [vmem:[#allocation3 + $0x68] sm:$0xff] }
 0x196   : > { %v1871_v39 = vadd.f32 %v1855_v20, %v1819_v9  ;;  %v1768_v40 = vadd.f32 %v1752_v0, %v1716_v26  ;;  %v1806_v24 = vmul.f32 %v3245_v15, %v1786_v41  ;;  %v1858_v35 = vmul.f32 %v3249_v50, %v1838_v11 }
 0x197   : > { %v1872_v43 = vadd.f32 %v1856_v44, %v1820_v21  ;;  %v1717_v32 = vadd.f32 %v1701_v47, %v1665_v27  ;;  %v1613_v1 = vadd.f32 %v1597_v18, %v1561_v23  ;;  %v1702_v51 = vmul.f32 %v1837_v42, %v3236_v8  ;;  %v1840_v18 = vld [vmem:[#allocation3 + $0x69] sm:$0xff] }
 0x198   : > { %v1923_v49 = vadd.f32 %v1907_v31, %v1871_v39  ;;  %v1821_v20 = vadd.f32 %v1805_v63, %v1768_v40  ;;  %v1754_v36 = vmul.f32 %v1889_v14, %v3239_v10  ;;  %v1510_v53 = vmul.f32 %v1784_v4, %v3224_v61  ;;  %v1892_v40 = vld [vmem:[#allocation3 + $0x6a] sm:$0xff] }
 0x199   : > { %v1924_v59 = vadd.f32 %v1908_v45, %v1872_v43  ;;  %v1546_v37 = vmul.f32 %v1836_v19, %v3227_v2  ;;  %v1769_v44 = vadd.f32 %v1753_v34, %v1717_v32  ;;  %v1666_v56 = vadd.f32 %v1650_v54, %v1613_v1  ;;  %v1839_v19 = vld [vmem:[#allocation3 + $0x61] sm:$0xff] }
 0x19a   : > { %2468 = vmatprep.mubr.msk.f32.mxu1 %vm1450_vm4, %v1923_v49  ;;  %v1873_v31 = vadd.f32 %v1857_v5, %v1821_v20  ;;  %v1598_v17 = vmul.f32 %v1888_v6, %v3230_v62  ;;  %v1910_v13 = vmul.f32 %v3252_v25, %v1890_v7  ;;  %v1651_v45 = vmul.f32 %v1786_v41, %v3233_v57 }
 0x19b   : > { %2469 = vmatmul.mubr.msk.f32.vlgmr.msra.gmra.mrb[2].mxu1 %vm1450_vm4, %v1924_v59  ;;  %v1562_v46 = vadd.f32 %v1546_v37, %v1510_v53  ;;  %v1822_v55 = vadd.f32 %v1806_v24, %v1769_v44  ;;  %v1718_v58 = vadd.f32 %v1702_v51, %v1666_v56  ;;  %v1807_v4 = vmul.f32 %v3245_v15, %v1787_v52  ;;  %v1893_v44 = vld [vmem:[#allocation3 + $0x7a] sm:$0xff] }
 0x19c   : > { %v1925_v38 = vadd.f32 %v1909_v22, %v1873_v31  ;;  %v1859_v29 = vmul.f32 %v3249_v50, %v1839_v19  ;;  %v1703_v63 = vmul.f32 %v1838_v11, %v3236_v8  ;;  %v1511_v6 = vmul.f32 %v3273_v60, %v3224_v61  ;;  %v1841_v31 = vld [vmem:[#allocation3 + $0x79] sm:$0xff] }
 0x19d   : > { %v1614_v0 = vadd.f32 %v1598_v17, %v1562_v46  ;;  %v1874_v12 = vadd.f32 %v1858_v35, %v1822_v55  ;;  %v1770_v5 = vadd.f32 %v1754_v36, %v1718_v58  ;;  %v1547_v3 = vmul.f32 %v1837_v42, %v3227_v2 }
 0x19e   : > { %2471 = vmatprep.mubr.msk.f32.mxu1 %vm1450_vm4, %v1925_v38  ;;  %v1599_v9 = vmul.f32 %v1889_v14, %v3230_v62  ;;  %v1911_v48 = vmul.f32 %v3252_v25, %v1891_v16  ;;  %v1755_v47 = vmul.f32 %v1890_v7, %v3239_v10  ;;  %v1652_v60 = vmul.f32 %v1787_v52, %v3233_v57 }
 0x19f   : > { %v1667_v22 = vadd.f32 %v1651_v45, %v1614_v0  ;;  %v1926_v26 = vadd.f32 %v1910_v13, %v1874_v12  ;;  %v1823_v28 = vadd.f32 %v1807_v4, %v1770_v5  ;;  %v1563_v33 = vadd.f32 %v1547_v3, %v1511_v6 }
 0x1a0   : > { %v1808_v21 = vmul.f32 %v3245_v15, %v1788_v30  ;;  %v1704_v34 = vmul.f32 %v1839_v19, %v3236_v8  ;;  %v1512_v42 = vmul.f32 %v1786_v41, %v3224_v61  ;;  %v1548_v23 = vmul.f32 %v1838_v11, %v3227_v2  ;;  %v1789_v41 = vld [vmem:[#allocation3 + $0x78] sm:$0xff] }
 0x1a1   : > { %v1719_v39 = vadd.f32 %v1703_v63, %v1667_v22  ;;  %2472 = vmatmul.mubr.msk.f32.gmra.mrb[4].mxu1 %vm1450_vm4, %v1926_v26  ;;  %v1875_v14 = vadd.f32 %v1859_v29, %v1823_v28  ;;  %v1615_v27 = vadd.f32 %v1599_v9, %v1563_v33  ;;  %v1600_v54 = vmul.f32 %v1890_v7, %v3230_v62 }
 0x1a2   : > { %v1860_v43 = vmul.f32 %v3249_v50, %v1840_v18  ;;  %v1912_v24 = vmul.f32 %v3252_v25, %v1892_v40  ;;  %v1756_v35 = vmul.f32 %v1891_v16, %v3239_v10  ;;  %v1564_v1 = vadd.f32 %v1548_v23, %v1512_v42 }
 0x1a3   : > { %v1771_v49 = vadd.f32 %v1755_v47, %v1719_v39  ;;  %v1927_v20 = vadd.f32 %v1911_v48, %v1875_v14  ;;  %v1668_v32 = vadd.f32 %v1652_v60, %v1615_v27  ;;  %v1653_v51 = vmul.f32 %v1788_v30, %v3233_v57  ;;  %v1894_v60 = vld [vmem:[#allocation3 + $0x82] sm:$0xff]  ;;  %v1791_v39 = vld [vmem:[#allocation3 + $0x90] sm:$0xff] }
 0x1a4   : > { %v1809_v36 = vmul.f32 %v3245_v15, %v1789_v41  ;;  %v1705_v11 = vmul.f32 %v1840_v18, %v3236_v8  ;;  %v1513_v53 = vmul.f32 %v1787_v52, %v3224_v61  ;;  %v1616_v7 = vadd.f32 %v1600_v54, %v1564_v1  ;;  %v1790_v52 = vld [vmem:[#allocation3 + $0x80] sm:$0xff] }
 0x1a5   : > { %v1824_v59 = vadd.f32 %v1808_v21, %v1771_v49  ;;  %2474 = vmatprep.mubr.msk.f32.mxu1 %vm1450_vm4, %v1927_v20  ;;  %v1720_v37 = vadd.f32 %v1704_v34, %v1668_v32  ;;  %v1549_v56 = vmul.f32 %v1839_v19, %v3227_v2  ;;  %v1601_v17 = vmul.f32 %v1891_v16, %v3230_v62  ;;  %v1842_v16 = vld [vmem:[#allocation3 + $0x81] sm:$0xff]  ;;  %v1895_v49 = vld [vmem:[#allocation3 + $0x92] sm:$0xff] }
 0x1a6   : > { %v1861_v46 = vmul.f32 %v3249_v50, %v1841_v31  ;;  %v1913_v45 = vmul.f32 %v3252_v25, %v1893_v44  ;;  %v1757_v38 = vmul.f32 %v1892_v40, %v3239_v10  ;;  %v1669_v58 = vadd.f32 %v1653_v51, %v1616_v7 }
 0x1a7   : > { %v1876_v13 = vadd.f32 %v1860_v43, %v1824_v59  ;;  %v1772_v55 = vadd.f32 %v1756_v35, %v1720_v37  ;;  %v1565_v4 = vadd.f32 %v1549_v56, %v1513_v53  ;;  %v1654_v29 = vmul.f32 %v1789_v41, %v3233_v57 }
 0x1a8   : > { %v1810_v63 = vmul.f32 %v3245_v15, %v1790_v52  ;;  %v1706_v19 = vmul.f32 %v1841_v31, %v3236_v8  ;;  %v1514_v6 = vmul.f32 %v1788_v30, %v3224_v61  ;;  %v1721_v5 = vadd.f32 %v1705_v11, %v1669_v58  ;;  %v1844_v11 = vld [vmem:[#allocation3 + $0x99] sm:$0xff] }
 0x1a9   : > { %v1928_v0 = vadd.f32 %v1912_v24, %v1876_v13  ;;  %v1825_v12 = vadd.f32 %v1809_v36, %v1772_v55  ;;  %v1617_v3 = vadd.f32 %v1601_v17, %v1565_v4  ;;  %v1550_v9 = vmul.f32 %v1840_v18, %v3227_v2  ;;  %v1792_v36 = vld [vmem:[#allocation3 + $0x98] sm:$0xff] }
 0x1aa   : > { %v1862_v48 = vmul.f32 %v3249_v50, %v1842_v16  ;;  %v1758_v22 = vmul.f32 %v1893_v44, %v3239_v10  ;;  %v1602_v47 = vmul.f32 %v1892_v40, %v3230_v62  ;;  %v1655_v26 = vmul.f32 %v1790_v52, %v3233_v57  ;;  %v1843_v40 = vld [vmem:[#allocation3 + $0x91] sm:$0xff] }
 0x1ab   : > { %2475 = vmatmul.mubr.msk.f32.gmra.mrb[6].mxu1 %vm1450_vm4, %v1928_v0  ;;  %v1877_v28 = vadd.f32 %v1861_v46, %v1825_v12  ;;  %v1773_v33 = vadd.f32 %v1757_v38, %v1721_v5  ;;  %v1670_v30 = vadd.f32 %v1654_v29, %v1617_v3  ;;  %v1566_v21 = vadd.f32 %v1550_v9, %v1514_v6  ;;  %v1896_v46 = vld [vmem:[#allocation3 + $0x9a] sm:$0xff] }
 0x1ac   : > { %v1914_v34 = vmul.f32 %v3252_v25, %v1894_v60  ;;  %v1811_v42 = vmul.f32 %v3245_v15, %v1791_v39  ;;  %v1707_v14 = vmul.f32 %v1842_v16, %v3236_v8  ;;  %v1515_v18 = vmul.f32 %v1789_v41, %v3224_v61 }
 0x1ad   : > { %v1929_v27 = vadd.f32 %v1913_v45, %v1877_v28  ;;  %v1826_v23 = vadd.f32 %v1810_v63, %v1773_v33  ;;  %v1722_v54 = vadd.f32 %v1706_v19, %v1670_v30  ;;  %v1618_v43 = vadd.f32 %v1602_v47, %v1566_v21  ;;  %v1793_v19 = vld [vmem:[#allocation3 + $0xa8] sm:$0xff] }
 0x1ae   : > { %v1863_v24 = vmul.f32 %v3249_v50, %v1843_v40  ;;  %v1915_v35 = vmul.f32 %v3252_v25, %v1895_v49  ;;  %v1551_v20 = vmul.f32 %v1841_v31, %v3227_v2  ;;  %v1603_v32 = vmul.f32 %v1893_v44, %v3230_v62  ;;  %v1845_v47 = vld [vmem:[#allocation3 + $0xa9] sm:$0xff] }
 0x1af   : > { %2477 = vmatprep.mubr.msk.f32.mxu1 %vm1450_vm4, %v1929_v27  ;;  %v1878_v1 = vadd.f32 %v1862_v48, %v1826_v23  ;;  %v1774_v51 = vadd.f32 %v1758_v22, %v1722_v54  ;;  %v1671_v59 = vadd.f32 %v1655_v26, %v1618_v43  ;;  %v1759_v41 = vmul.f32 %v1894_v60, %v3239_v10  ;;  %v1897_v26 = vld [vmem:[#allocation3 + $0xaa] sm:$0xff] }
 0x1b0   : > { %v1812_v53 = vmul.f32 %v3245_v15, %v1792_v36  ;;  %v1864_v37 = vmul.f32 %v3249_v50, %v1844_v11  ;;  %v1567_v7 = vadd.f32 %v1551_v20, %v1515_v18  ;;  %v1656_v56 = vmul.f32 %v1791_v39, %v3233_v57  ;;  %v1846_v20 = vld [vmem:[#allocation3 + $0xb1] sm:$0xff] }
 0x1b1   : > { %v1930_v17 = vadd.f32 %v1914_v34, %v1878_v1  ;;  %v1827_v31 = vadd.f32 %v1811_v42, %v1774_v51  ;;  %v1723_v13 = vadd.f32 %v1707_v14, %v1671_v59  ;;  %v1516_v44 = vmul.f32 %v1790_v52, %v3224_v61 }
 0x1b2   : > { %v1619_v45 = vadd.f32 %v1603_v32, %v1567_v7  ;;  %v1708_v38 = vmul.f32 %v1843_v40, %v3236_v8  ;;  %v1552_v55 = vmul.f32 %v1842_v16, %v3227_v2  ;;  %v1604_v58 = vmul.f32 %v1894_v60, %v3230_v62 }
 0x1b3   : > { %2478 = vmatmul.mubr.msk.f32.gmra.mrb[8].mxu1 %vm1450_vm4, %v1930_v17  ;;  %v1879_v4 = vadd.f32 %v1863_v24, %v1827_v31  ;;  %v1775_v29 = vadd.f32 %v1759_v41, %v1723_v13  ;;  %v1916_v0 = vmul.f32 %v3252_v25, %v1896_v46  ;;  %v1760_v63 = vmul.f32 %v1895_v49, %v3239_v10  ;;  %v1795_v17 = vld [vmem:[#allocation3 + $0xc0] sm:$0xff] }
 0x1b4   : > { %v1672_v6 = vadd.f32 %v1656_v56, %v1619_v45  ;;  %v1813_v52 = vmul.f32 %v3245_v15, %v1793_v19  ;;  %v1568_v12 = vadd.f32 %v1552_v55, %v1516_v44  ;;  %v1657_v5 = vmul.f32 %v1792_v36, %v3233_v57  ;;  %v1898_v56 = vld [vmem:[#allocation3 + $0xb2] sm:$0xff] }
 0x1b5   : > { %v1931_v3 = vadd.f32 %v1915_v35, %v1879_v4  ;;  %v1828_v9 = vadd.f32 %v1812_v53, %v1775_v29  ;;  %v1709_v16 = vmul.f32 %v1844_v11, %v3236_v8  ;;  %v1517_v48 = vmul.f32 %v1791_v39, %v3224_v61  ;;  %v1794_v39 = vld [vmem:[#allocation3 + $0xb0] sm:$0xff] }
 0x1b6   : > { %v1724_v22 = vadd.f32 %v1708_v38, %v1672_v6  ;;  %v1620_v28 = vadd.f32 %v1604_v58, %v1568_v12  ;;  %v1553_v33 = vmul.f32 %v1843_v40, %v3227_v2  ;;  %v1605_v60 = vmul.f32 %v1895_v49, %v3230_v62  ;;  %v1899_v12 = vld [vmem:[#allocation3 + $0xc2] sm:$0xff] }
 0x1b7   : > { %2480 = vmatprep.mubr.msk.f32.mxu1 %vm1450_vm4, %v1931_v3  ;;  %v1880_v30 = vadd.f32 %v1864_v37, %v1828_v9  ;;  %v1865_v21 = vmul.f32 %v3249_v50, %v1845_v47  ;;  %v1917_v34 = vmul.f32 %v3252_v25, %v1897_v26  ;;  %v1761_v42 = vmul.f32 %v1896_v46, %v3239_v10 }
 0x1b8   : > { %v1776_v14 = vadd.f32 %v1760_v63, %v1724_v22  ;;  %v1673_v18 = vadd.f32 %v1657_v5, %v1620_v28  ;;  %v1569_v27 = vadd.f32 %v1553_v33, %v1517_v48  ;;  %v1658_v23 = vmul.f32 %v1793_v19, %v3233_v57 }
 0x1b9   : > { %v1932_v54 = vadd.f32 %v1916_v0, %v1880_v30  ;;  %v1814_v40 = vmul.f32 %v3245_v15, %v1794_v39  ;;  %v1710_v49 = vmul.f32 %v1845_v47, %v3236_v8  ;;  %v1518_v43 = vmul.f32 %v1792_v36, %v3224_v61 }
 0x1ba   : > { %v1829_v24 = vadd.f32 %v1813_v52, %v1776_v14  ;;  %v1725_v35 = vadd.f32 %v1709_v16, %v1673_v18  ;;  %v1621_v32 = vadd.f32 %v1605_v60, %v1569_v27  ;;  %v1554_v1 = vmul.f32 %v1844_v11, %v3227_v2  ;;  %v1848_v60 = vld [vmem:[#allocation3 + $0xc9] sm:$0xff] }
 0x1bb   : > { %2481 = vmatmul.mubr.msk.f32.gmra.mrb[10].mxu1 %vm1450_vm4, %v1932_v54  ;;  %v1866_v51 = vmul.f32 %v3249_v50, %v1846_v20  ;;  %v1762_v59 = vmul.f32 %v1897_v26, %v3239_v10  ;;  %v1606_v41 = vmul.f32 %v1896_v46, %v3230_v62  ;;  %v1659_v53 = vmul.f32 %v1794_v39, %v3233_v57  ;;  %v1847_v46 = vld [vmem:[#allocation3 + $0xc1] sm:$0xff]  ;;  %v1900_v54 = vld [vmem:[#allocation3 + $0xca] sm:$0xff] }
 0x1bc   : > { %v1881_v37 = vadd.f32 %v1865_v21, %v1829_v24  ;;  %v1777_v7 = vadd.f32 %v1761_v42, %v1725_v35  ;;  %v1674_v36 = vadd.f32 %v1658_v23, %v1621_v32  ;;  %v1570_v31 = vadd.f32 %v1554_v1, %v1518_v43  ;;  %v1797_v23 = vld [vmem:[#allocation3 + $0xd8] sm:$0xff] }
 0x1bd   : > { %v1918_v13 = vmul.f32 %v3252_v25, %v1898_v56  ;;  %v1815_v11 = vmul.f32 %v3245_v15, %v1795_v17  ;;  %v1711_v44 = vmul.f32 %v1846_v20, %v3236_v8  ;;  %v1519_v45 = vmul.f32 %v1793_v19, %v3224_v61  ;;  %v1796_v19 = vld [vmem:[#allocation3 + $0xc8] sm:$0xff]  ;;  %v1849_v35 = vld [vmem:[#allocation3 + $0xd9] sm:$0xff] }
 0x1be   : > { %v1933_v38 = vadd.f32 %v1917_v34, %v1881_v37  ;;  %v1830_v55 = vadd.f32 %v1814_v40, %v1777_v7  ;;  %v1726_v58 = vadd.f32 %v1710_v49, %v1674_v36  ;;  %v1622_v4 = vadd.f32 %v1606_v41, %v1570_v31  ;;  %v1798_v41 = vld [vmem:[#allocation3 + $0xe0] sm:$0xff] }
 0x1bf   : > { %v1867_v29 = vmul.f32 %v3249_v50, %v1847_v46  ;;  %v1555_v0 = vmul.f32 %v1845_v47, %v3227_v2  ;;  %v1607_v63 = vmul.f32 %v1897_v26, %v3230_v62  ;;  %v1763_v3 = vmul.f32 %v1898_v56, %v3239_v10  ;;  %v1850_v36 = vld [vmem:[#allocation3 + $0xe1] sm:$0xff] }
 0x1c0   : > { %2483 = vmatprep.mubr.msk.f32.mxu1 %vm1450_vm4, %v1933_v38  ;;  %v1882_v6 = vadd.f32 %v1866_v51, %v1830_v55  ;;  %v1778_v52 = vadd.f32 %v1762_v59, %v1726_v58  ;;  %v1675_v5 = vadd.f32 %v1659_v53, %v1622_v4  ;;  %v1919_v9 = vmul.f32 %v3252_v25, %v1899_v12  ;;  %v1901_v59 = vld [vmem:[#allocation3 + $0xda] sm:$0xff] }
 0x1c1   : > { %v1816_v16 = vmul.f32 %v3245_v15, %v1796_v19  ;;  %v1571_v48 = vadd.f32 %v1555_v0, %v1519_v45  ;;  %v1660_v22 = vmul.f32 %v1795_v17, %v3233_v57  ;;  %v1520_v26 = vmul.f32 %v1794_v39, %v3224_v61 }
 0x1c2   : > { %v1934_v28 = vadd.f32 %v1918_v13, %v1882_v6  ;;  %v1831_v47 = vadd.f32 %v1815_v11, %v1778_v52  ;;  %v1727_v33 = vadd.f32 %v1711_v44, %v1675_v5  ;;  %v1712_v21 = vmul.f32 %v1847_v46, %v3236_v8 }
 0x1c3   : > { %v1623_v30 = vadd.f32 %v1607_v63, %v1571_v48  ;;  %v1556_v34 = vmul.f32 %v1846_v20, %v3227_v2  ;;  %v1608_v42 = vmul.f32 %v1898_v56, %v3230_v62  ;;  %v1868_v27 = vmul.f32 %v3249_v50, %v1848_v60 }
 0x1c4   : > { %2484 = vmatmul.mubr.msk.f32.gmra.mrb[12].mxu1 %vm1450_vm4, %v1934_v28  ;;  %v1883_v14 = vadd.f32 %v1867_v29, %v1831_v47  ;;  %v1779_v18 = vadd.f32 %v1763_v3, %v1727_v33  ;;  %v1764_v49 = vmul.f32 %v1899_v12, %v3239_v10  ;;  %v1661_v39 = vmul.f32 %v1796_v19, %v3233_v57 }
 0x1c5   : > { %v1676_v40 = vadd.f32 %v1660_v22, %v1623_v30  ;;  %v1572_v61 = vadd.f32 %v1556_v34, %v1520_v26  ;;  %v1920_v2 = vmul.f32 %v3252_v25, %v1900_v54  ;;  %v1817_v20 = vmul.f32 %v3245_v15, %v1797_v23 }
 0x1c6   : > { %v1935_v43 = vadd.f32 %v1919_v9, %v1883_v14  ;;  %v1832_v24 = vadd.f32 %v1816_v16, %v1779_v18  ;;  %v1713_v1 = vmul.f32 %v1848_v60, %v3236_v8  ;;  %v1869_v37 = vmul.f32 %v3249_v50, %v1849_v35  ;;  %v1902_v8 = vld [vmem:[#allocation3 + $0xe2] sm:$0xff] }
 0x1c7   : > { %v1728_v62 = vadd.f32 %v1712_v21, %v1676_v40  ;;  %v1624_v32 = vadd.f32 %v1608_v42, %v1572_v61  ;;  %v1765_v7 = vmul.f32 %v1900_v54, %v3239_v10  ;;  %v1921_v31 = vmul.f32 %v3252_v25, %v1901_v59 }
 0x1c8   : > { %2486 = vmatprep.mubr.msk.f32.mxu1 %vm1450_vm4, %v1935_v43  ;;  %v1884_v51 = vadd.f32 %v1868_v27, %v1832_v24  ;;  %v1818_v11 = vmul.f32 %v3245_v15, %v1798_v41  ;;  %v1870_v38 = vmul.f32 %v3249_v50, %v1850_v36  ;;  %v1922_v10 = vmul.f32 %v3252_v25, %v1902_v8  ;;  %v2371_v15 = vld [vmem:[%s3473_s8] ss:$0 sm:$0xff] }
 0x1c9   : > { %v1780_v53 = vadd.f32 %v1764_v49, %v1728_v62  ;;  %v1677_v57 = vadd.f32 %v1661_v39, %v1624_v32 }
 0x1ca   : > { %v1936_v56 = vadd.f32 %v1920_v2, %v1884_v51 }
 0x1cb   : > { %v1833_v17 = vadd.f32 %v1817_v20, %v1780_v53  ;;  %v1729_v13 = vadd.f32 %v1713_v1, %v1677_v57 }
 0x1cc   : > { %2487 = vmatmul.mubr.msk.f32.gmra.mrb[14].mxu1 %vm1450_vm4, %v1936_v56 }
 0x1cd   : > { %v1885_v44 = vadd.f32 %v1869_v37, %v1833_v17  ;;  %v1781_v45 = vadd.f32 %v1765_v7, %v1729_v13 }
 0x1cf   : > { %v1937_v55 = vadd.f32 %v1921_v31, %v1885_v44  ;;  %v1834_v58 = vadd.f32 %v1818_v11, %v1781_v45 }
 0x1d1   : > { %2489 = vmatprep.mubr.msk.f32.mxu1 %vm1450_vm4, %v1937_v55  ;;  %v1886_v46 = vadd.f32 %v1870_v38, %v1834_v58 }
 0x1d3   : > { %v1938_v4 = vadd.f32 %v1922_v10, %v1886_v46 }
 0x1d5   : > { %2490 = vmatmul.mubr.msk.f32.gmra.mrb[16].mxu1 %vm1450_vm4, %v1938_v4 }
 0x26e   : > { %v2470_v29 = vpop.f32.mrb[2].mxu1 }
 0x26f   : > { %v2067_v0 = vadd.f32 %v2470_v29, %v2371_v15  ;;  %v2061_v50 = vpop.f32.mrb[3].mxu1 }
 0x270   : > { %v2062_v63 = vadd.f32 %v2371_v15, %v2061_v50 }
 0x271   : > { %v2141_v6 = vmax.f32 %v2067_v0, 0.0 }
 0x272   : > { %v2140_v52 = vmax.f32 %v2062_v63, 0.0 }
 0x273   : > { %2157 = vst.msk [vmem:[%s2737_s29 + $0x8] sm:$0xff] %vm1450_vm4, %v2141_v6 }
 0x274   : > { %2156 = vst.msk [vmem:[%s2737_s29] sm:$0xff] %vm1450_vm4, %v2140_v52  ;;  %v2473_v25 = vpop.f32.mrb[4].mxu1 }
 0x275   : > { %v2077_v12 = vadd.f32 %v2473_v25, %v2371_v15  ;;  %v2071_v5 = vpop.f32.mrb[5].mxu1 }
 0x276   : > { %v2072_v3 = vadd.f32 %v2371_v15, %v2071_v5 }
 0x277   : > { %v2143_v19 = vmax.f32 %v2077_v12, 0.0 }
 0x278   : > { %v2142_v9 = vmax.f32 %v2072_v3, 0.0 }
 0x279   : > { %2159 = vst.msk [vmem:[%s2737_s29 + $0x18] sm:$0xff] %vm1450_vm4, %v2143_v19 }
 0x27a   : > { %2158 = vst.msk [vmem:[%s2737_s29 + $0x10] sm:$0xff] %vm1450_vm4, %v2142_v9 }
 0x27e   : > { %v2476_v16 = vpop.f32.mrb[6].mxu1 }
 0x27f   : > { %v2087_v48 = vadd.f32 %v2476_v16, %v2371_v15  ;;  %v2081_v22 = vpop.f32.mrb[7].mxu1 }
 0x280   : > { %v2082_v28 = vadd.f32 %v2371_v15, %v2081_v22 }
 0x281   : > { %v2145_v47 = vmax.f32 %v2087_v48, 0.0 }
 0x282   : > { %v2144_v33 = vmax.f32 %v2082_v28, 0.0 }
 0x283   : > { %2161 = vst.msk [vmem:[%s2737_s29 + $0x28] sm:$0xff] %vm1450_vm4, %v2145_v47 }
 0x284   : > { %2160 = vst.msk [vmem:[%s2737_s29 + $0x20] sm:$0xff] %vm1450_vm4, %v2144_v33 }
 0x286   : > { %v2479_v26 = vpop.f32.mrb[8].mxu1 }
 0x287   : > { %v2097_v60 = vadd.f32 %v2479_v26, %v2371_v15  ;;  %v2091_v30 = vpop.f32.mrb[9].mxu1 }
 0x288   : > { %v2092_v21 = vadd.f32 %v2371_v15, %v2091_v30 }
 0x289   : > { %v2147_v34 = vmax.f32 %v2097_v60, 0.0 }
 0x28a   : > { %v2146_v42 = vmax.f32 %v2092_v21, 0.0 }
 0x28b   : > { %2163 = vst.msk [vmem:[%s2737_s29 + $0x38] sm:$0xff] %vm1450_vm4, %v2147_v34 }
 0x28c   : > { %2162 = vst.msk [vmem:[%s2737_s29 + $0x30] sm:$0xff] %vm1450_vm4, %v2146_v42 }
 0x28e   : > { %v2482_v14 = vpop.f32.mrb[10].mxu1 }
 0x28f   : > { %v2107_v18 = vadd.f32 %v2482_v14, %v2371_v15  ;;  %v2101_v27 = vpop.f32.mrb[11].mxu1 }
 0x290   : > { %v2102_v23 = vadd.f32 %v2371_v15, %v2101_v27 }
 0x291   : > { %v2149_v54 = vmax.f32 %v2107_v18, 0.0 }
 0x292   : > { %v2148_v40 = vmax.f32 %v2102_v23, 0.0 }
 0x293   : > { %2165 = vst.msk [vmem:[%s2737_s29 + $0x48] sm:$0xff] %vm1450_vm4, %v2149_v54 }
 0x294   : > { %2164 = vst.msk [vmem:[%s2737_s29 + $0x40] sm:$0xff] %vm1450_vm4, %v2148_v40 }
 0x297   : > { %v2485_v49 = vpop.f32.mrb[12].mxu1 }
 0x298   : > { %v2117_v61 = vadd.f32 %v2485_v49, %v2371_v15  ;;  %v2111_v39 = vpop.f32.mrb[13].mxu1 }
 0x299   : > { %v2112_v43 = vadd.f32 %v2371_v15, %v2111_v39 }
 0x29a   : > { %v2151_v24 = vmax.f32 %v2117_v61, 0.0 }
 0x29b   : > { %v2150_v2 = vmax.f32 %v2112_v43, 0.0 }
 0x29c   : > { %2167 = vst.msk [vmem:[%s2737_s29 + $0x58] sm:$0xff] %vm1450_vm4, %v2151_v24 }
 0x29d   : > { %2166 = vst.msk [vmem:[%s2737_s29 + $0x50] sm:$0xff] %vm1450_vm4, %v2150_v2 }
 0x29f   : > { %v2488_v35 = vpop.f32.mrb[14].mxu1 }
 0x2a0   : > { %v2127_v62 = vadd.f32 %v2488_v35, %v2371_v15  ;;  %v2121_v20 = vpop.f32.mrb[15].mxu1 }
 0x2a1   : > { %v2122_v32 = vadd.f32 %v2371_v15, %v2121_v20 }
 0x2a2   : > { %v2153_v1 = vmax.f32 %v2127_v62, 0.0 }
 0x2a3   : > { %v2152_v51 = vmax.f32 %v2122_v32, 0.0 }
 0x2a4   : > { %2169 = vst.msk [vmem:[%s2737_s29 + $0x68] sm:$0xff] %vm1450_vm4, %v2153_v1 }
 0x2a5   : > { %2168 = vst.msk [vmem:[%s2737_s29 + $0x60] sm:$0xff] %vm1450_vm4, %v2152_v51 }
 0x2a8   : > { %v2491_v59 = vpop.f32.mrb[16].mxu1 }
 0x2a9   : > { %v2137_v41 = vadd.f32 %v2491_v59, %v2371_v15  ;;  %v2131_v53 = vpop.f32.mrb[17].mxu1 }
 0x2aa   : > { %v2132_v37 = vadd.f32 %v2371_v15, %v2131_v53 }
 0x2ab   : > { %v2155_v57 = vmax.f32 %v2137_v41, 0.0 }
 0x2ac   : > { %v2154_v7 = vmax.f32 %v2132_v37, 0.0 }
 0x2ad   : > { %2171 = vst.msk [vmem:[%s2737_s29 + $0x78] sm:$0xff] %vm1450_vm4, %v2155_v57 }
 0x2ae   : > { %2170 = vst.msk [vmem:[%s2737_s29 + $0x70] sm:$0xff] %vm1450_vm4, %v2154_v7 }
 0x2af PF: > { %s19_s13 = sadd.s32 1, %s2577_s13   ;;  %s3480_s30 = smov %s2569_s11 }
 0x2b0   : > { %p16_p1 = scmp.ge.s32.totalorder %s19_s13, 6   ;;  %s3481_s10 = smov %s2573_s12 }
 0x2b1   : > { %s3482_s11 = smov %s3485_s14  ;;  %s3483_s12 = smov %s3489_s15 }
 0x2b2   :  { %18 = sbr.rel (!%p16_p1) target bundleno = 4 (0x4), region = 123 }

</bundles_post_ra>
